<compile_context>
chip_gen: v6e
topology: v6e:2x2x1
jax: 0.10.0
libtpu: 0.0.40
codegen_flags: <defaults>
</compile_context>

<pallas_src>
import functools

import jax
import jax.numpy as jnp
import numpy as np
from jax import lax
from jax.experimental import pallas as pl
from jax.experimental.pallas import tpu as pltpu

EPS = 1e-5


# ------------------------------ Pallas kernel -------------------------------

def _fused_residual_block_kernel(xpad_ref, col_ref,
                                 w1_ref, b1_ref, g1_ref, bt1_ref,
                                 w2_ref, b2_ref, g2_ref, bt2_ref,
                                 o_ref, ypad_ref, *, H, W):
    """One batch element.

    xpad_ref : (1, C, P) bf16   reflect-padded input, flat (P = (H+2)*(W+2))
    col_ref  : (1, L)    int32  j -> j % (W+2), with L = H*(W+2) - 2
    w*_ref   : (9, C, C) bf16   tap t = kh*3+kw : w[t, co, ci] = W[co, ci, kh, kw]
    b/g/bt   : (C, 1)    f32
    o_ref    : (1, C, L) f32    conv output in the same flat coordinates
    ypad_ref : (C, P)    bf16   VMEM scratch: reflect-padded stage-1 output
    """
    Wp = W + 2
    P = (H + 2) * Wp
    L = H * Wp - 2
    inv_hw = 1.0 / float(H * W)
    C = o_ref.shape[1]

    col = col_ref[...]            # (1, L)
    valid = col < W               # lanes that are real (h, w) positions

    def conv3x3_in(load_tap, w_ref, b_ref, g_ref, bt_ref):
        # 3x3 conv as 9 accumulating MXU matmuls over lane-shifted windows,
        # then a masked single-pass InstanceNorm (E[x^2] - E[x]^2) + affine.
        acc = jnp.zeros((C, L), jnp.float32)
        for kh in range(3):
            for kw in range(3):
                acc = acc + jnp.dot(w_ref[kh * 3 + kw],
                                    load_tap(kh * Wp + kw),
                                    preferred_element_type=jnp.float32)
        acc = acc + b_ref[...]                                  # conv bias
        s1 = jnp.sum(jnp.where(valid, acc, 0.0), axis=-1, keepdims=True)
        s2 = jnp.sum(jnp.where(valid, acc * acc, 0.0), axis=-1, keepdims=True)
        mean = s1 * inv_hw
        var = jnp.maximum(s2 * inv_hw - mean * mean, 0.0)
        y = (acc - mean) * lax.rsqrt(var + EPS)
        return y * g_ref[...] + bt_ref[...]

    # -------- stage 1: conv1 -> IN1 -> ReLU ---------------------------------
    y1 = conv3x3_in(lambda d: xpad_ref[0, :, d:d + L],
                    w1_ref, b1_ref, g1_ref, bt1_ref)
    y1 = jnp.maximum(y1, 0.0).astype(jnp.bfloat16)

    # -------- rebuild ReflectionPad2d(1)(y1) inside VMEM --------------------
    # y1[j] (j = h*(W+2)+w, valid when w < W) lands at padded position j+W+3.
    ypad_ref[...] = jnp.zeros_like(ypad_ref)
    ypad_ref[:, W + 3:W + 3 + L] = y1                                 # interior
    # left border (padded col 0, rows 1..H)  <- y1 col 1
    cur = ypad_ref[:, W + 1:W + 1 + L]
    ypad_ref[:, W + 1:W + 1 + L] = jnp.where(col == 1, y1, cur)
    # right border (padded col W+1, rows 1..H) <- y1 col W-2
    cur = ypad_ref[:, W + 5:W + 5 + L]
    ypad_ref[:, W + 5:W + 5 + L] = jnp.where(col == W - 2, y1, cur)
    # top padded row <- padded row 2 ; bottom padded row <- padded row H-1
    ypad_ref[:, 0:Wp] = ypad_ref[:, 2 * Wp:3 * Wp]
    ypad_ref[:, (H + 1) * Wp:(H + 2) * Wp] = ypad_ref[:, (H - 1) * Wp:H * Wp]

    # -------- stage 2: conv2 -> IN2 -> + residual ---------------------------
    y2 = conv3x3_in(lambda d: ypad_ref[:, d:d + L],
                    w2_ref, b2_ref, g2_ref, bt2_ref)
    residual = xpad_ref[0, :, W + 3:W + 3 + L].astype(jnp.float32)
    o_ref[0] = (y2 + residual).astype(o_ref.dtype)


# -------------------------------- JAX glue ----------------------------------

def _flatten_taps(w):
    # (Cout, Cin, 3, 3) -> (9, Cout, Cin) with tap index t = kh*3 + kw.
    return jnp.transpose(w, (2, 3, 0, 1)).reshape(9, w.shape[0], w.shape[1])


def prepare_params(params):
    """One-time parameter prep, hoisted out of the per-forward path."""
    w1, b1, g1, bt1, w2, b2, g2, bt2 = params
    c = w1.shape[0]
    as_col = lambda v: v.reshape(c, 1).astype(jnp.float32)
    return (_flatten_taps(w1).astype(jnp.bfloat16),
            as_col(b1), as_col(g1), as_col(bt1),
            _flatten_taps(w2).astype(jnp.bfloat16),
            as_col(b2), as_col(g2), as_col(bt2))


@jax.jit
def residual_block_forward(x, prepared):
    """x: (N, C, H, W) float32 -> (N, C, H, W) float32."""
    w1, b1, g1, bt1, w2, b2, g2, bt2 = prepared
    N, C, H, W = x.shape
    assert H >= 2 and W >= 2
    Wp = W + 2
    P = (H + 2) * Wp
    L = H * Wp - 2

    xpad = jnp.pad(x, ((0, 0), (0, 0), (1, 1), (1, 1)), mode="reflect")
    xpad_flat = xpad.reshape(N, C, P).astype(jnp.bfloat16)
    col_ids = (jnp.arange(L, dtype=jnp.int32) % Wp).reshape(1, L)

    kernel = functools.partial(_fused_residual_block_kernel, H=H, W=W)
    const2 = lambda n: (0, 0)
    const3 = lambda n: (0, 0, 0)

    out_flat = pl.pallas_call(
        kernel,
        out_shape=jax.ShapeDtypeStruct((N, C, L), jnp.float32),
        grid_spec=pltpu.PrefetchScalarGridSpec(
            num_scalar_prefetch=0,
            grid=(N,),
            in_specs=[
                pl.BlockSpec((1, C, P), lambda n: (n, 0, 0)),   # padded x
                pl.BlockSpec((1, L), const2),                   # column ids
                pl.BlockSpec((9, C, C), const3),                # w1 taps
                pl.BlockSpec((C, 1), const2),                   # b1
                pl.BlockSpec((C, 1), const2),                   # gamma1
                pl.BlockSpec((C, 1), const2),                   # beta1
                pl.BlockSpec((9, C, C), const3),                # w2 taps
                pl.BlockSpec((C, 1), const2),                   # b2
                pl.BlockSpec((C, 1), const2),                   # gamma2
                pl.BlockSpec((C, 1), const2),                   # beta2
            ],
            out_specs=pl.BlockSpec((1, C, L), lambda n: (n, 0, 0)),
            scratch_shapes=[pltpu.VMEM((C, P), jnp.bfloat16)],
        ),
        compiler_params=pltpu.CompilerParams(
            dimension_semantics=("parallel",),   # batch across TCs (v7x: 2 TCs)
            vmem_limit_bytes=32 * 1024 * 1024,   # explicit budget (safe on v5e/v6e/v7x)
        ),
    )(xpad_flat, col_ids, w1, b1, g1, bt1, w2, b2, g2, bt2)

    # Drop the two junk lanes per image row: (N, C, L) -> (N, C, H, W).
    out = jnp.pad(out_flat, ((0, 0), (0, 0), (0, 2)))
    return out.reshape(N, C, H, Wp)[..., :W]


# --------------------------- pure-JAX references ----------------------------

def _conv_reflect(x, w, b):
    xp = jnp.pad(x, ((0, 0), (0, 0), (1, 1), (1, 1)), mode="reflect")
    y = lax.conv_general_dilated(
        xp, w, (1, 1), "VALID",
        dimension_numbers=("NCHW", "OIHW", "NCHW"),
        precision=lax.Precision.HIGHEST)
    return y + b[None, :, None, None]


def _inorm(x, g, bt):
    m = x.mean(axis=(2, 3), keepdims=True)
    v = ((x - m) ** 2).mean(axis=(2, 3), keepdims=True)
    return ((x - m) * lax.rsqrt(v + EPS) * g[None, :, None, None]
            + bt[None, :, None, None])


def _ref_forward(x, params, quantize):
    """quantize=True mirrors the kernel's bf16 MXU operands (f32 accumulation)."""
    w1, b1, g1, bt1, w2, b2, g2, bt2 = params
    if quantize:
        q = lambda a: a.astype(jnp.bfloat16).astype(jnp.float32)
    else:
        q = lambda a: a
    out = jax.nn.relu(_inorm(_conv_reflect(q(x), q(w1), b1), g1, bt1))
    out = _inorm(_conv_reflect(q(out), q(w2), b2), g2, bt2)
    return q(x) + out


# ---------------------------------- main -------------------------------------

if __name__ == "__main__":
    N, C, H, W = 2, 4, 16, 16

    key = jax.random.PRNGKey(0)
    ks = jax.random.split(key, 9)
    x = jax.random.normal(ks[0], (N, C, H, W), dtype=jnp.float32)

    # Deterministic synthetic parameters (shapes match the PyTorch module).
    w1 = 0.1 * jax.random.normal(ks[1], (C, C, 3, 3), dtype=jnp.float32)
    b1 = 0.1 * jax.random.normal(ks[2], (C,), dtype=jnp.float32)
    g1 = 1.0 + 0.1 * jax.random.normal(ks[3], (C,), dtype=jnp.float32)
    bt1 = 0.1 * jax.random.normal(ks[4], (C,), dtype=jnp.float32)
    w2 = 0.1 * jax.random.normal(ks[5], (C, C, 3, 3), dtype=jnp.float32)
    b2 = 0.1 * jax.random.normal(ks[6], (C,), dtype=jnp.float32)
    g2 = 1.0 + 0.1 * jax.random.normal(ks[7], (C,), dtype=jnp.float32)
    bt2 = 0.1 * jax.random.normal(ks[8], (C,), dtype=jnp.float32)
    params = (w1, b1, g1, bt1, w2, b2, g2, bt2)

    prepared = prepare_params(params)
    out = jax.block_until_ready(residual_block_forward(x, prepared))

    # Tight check vs a reference with the same bf16 operand rounding
    # (implementation correctness: padding / taps / InstanceNorm / residual).
    ref_q = jax.block_until_ready(_ref_forward(x, params, quantize=True))
    np.testing.assert_allclose(np.asarray(out), np.asarray(ref_q),
                               rtol=1e-2, atol=1e-2)

    # Loose check vs the exact f32 PyTorch semantics (only bf16 quantization
    # of the MXU operands separates the two).
    ref_f32 = jax.block_until_ready(_ref_forward(x, params, quantize=False))
    np.testing.assert_allclose(np.asarray(out), np.asarray(ref_f32),
                               rtol=5e-2, atol=5e-2)

    print("KERNEL_OK")
</pallas_src>

<mosaic_0001>
module attributes {stable_mosaic.version = 11 : i64} {
  func.func @_fused_residual_block_kernel(%arg0: i32, %arg1: memref<1x4x324xbf16, #tpu.memory_space<vmem>>, %arg2: memref<1x286xi32, #tpu.memory_space<vmem>>, %arg3: memref<9x4x4xbf16, #tpu.memory_space<vmem>>, %arg4: memref<4x1xf32, #tpu.memory_space<vmem>>, %arg5: memref<4x1xf32, #tpu.memory_space<vmem>>, %arg6: memref<4x1xf32, #tpu.memory_space<vmem>>, %arg7: memref<9x4x4xbf16, #tpu.memory_space<vmem>>, %arg8: memref<4x1xf32, #tpu.memory_space<vmem>>, %arg9: memref<4x1xf32, #tpu.memory_space<vmem>>, %arg10: memref<4x1xf32, #tpu.memory_space<vmem>>, %arg11: memref<1x4x286xf32, #tpu.memory_space<vmem>>, %arg12: memref<4x324xbf16, #tpu.memory_space<vmem>>) attributes {dimension_semantics = [#tpu.dimension_semantics<parallel>], iteration_bounds = array<i64: 2>, scalar_prefetch = 0 : i64, scratch_operands = 1 : i64, tpu.core_type = #tpu.core_type<tc>, window_params = [{transform_indices = @transform_0, window_bounds = array<i64: 1, 4, 324>}, {pipeline_mode = #tpu.pipeline_mode<synchronous>, transform_indices = @transform_1, window_bounds = array<i64: 1, 286>}, {pipeline_mode = #tpu.pipeline_mode<synchronous>, transform_indices = @transform_2, window_bounds = array<i64: 9, 4, 4>}, {pipeline_mode = #tpu.pipeline_mode<synchronous>, transform_indices = @transform_3, window_bounds = array<i64: 4, 1>}, {pipeline_mode = #tpu.pipeline_mode<synchronous>, transform_indices = @transform_4, window_bounds = array<i64: 4, 1>}, {pipeline_mode = #tpu.pipeline_mode<synchronous>, transform_indices = @transform_5, window_bounds = array<i64: 4, 1>}, {pipeline_mode = #tpu.pipeline_mode<synchronous>, transform_indices = @transform_6, window_bounds = array<i64: 9, 4, 4>}, {pipeline_mode = #tpu.pipeline_mode<synchronous>, transform_indices = @transform_7, window_bounds = array<i64: 4, 1>}, {pipeline_mode = #tpu.pipeline_mode<synchronous>, transform_indices = @transform_8, window_bounds = array<i64: 4, 1>}, {pipeline_mode = #tpu.pipeline_mode<synchronous>, transform_indices = @transform_9, window_bounds = array<i64: 4, 1>}, {transform_indices = @transform_10, window_bounds = array<i64: 1, 4, 286>}]} {
    %c0 = arith.constant 0 : index
    %c0_0 = arith.constant 0 : index
    %0 = vector.load %arg2[%c0, %c0_0] : memref<1x286xi32, #tpu.memory_space<vmem>>, vector<1x286xi32>
    %c16_i32 = arith.constant 16 : i32
    %1 = vector.broadcast %c16_i32 : i32 to vector<1x286xi32>
    %2 = arith.cmpi slt, %0, %1 : vector<1x286xi32>
    %cst = arith.constant 0.000000e+00 : f32
    %3 = vector.broadcast %cst : f32 to vector<4x286xf32>
    %c0_1 = arith.constant 0 : index
    %c0_2 = arith.constant 0 : index
    %c0_3 = arith.constant 0 : index
    %4 = vector.load %arg3[%c0_1, %c0_2, %c0_3] : memref<9x4x4xbf16, #tpu.memory_space<vmem>>, vector<1x4x4xbf16>
    %5 = vector.shape_cast %4 : vector<1x4x4xbf16> to vector<4x4xbf16>
    %c0_4 = arith.constant 0 : index
    %c0_5 = arith.constant 0 : index
    %c0_6 = arith.constant 0 : index
    %6 = vector.load %arg1[%c0_4, %c0_5, %c0_6] : memref<1x4x324xbf16, #tpu.memory_space<vmem>>, vector<1x4x286xbf16>
    %7 = vector.shape_cast %6 : vector<1x4x286xbf16> to vector<4x286xbf16>
    %cst_7 = arith.constant dense<0.000000e+00> : vector<4x286xf32>
    %8 = tpu.matmul %5, %7, %cst_7 {dimension_numbers = #tpu.dot_dimension_numbers<[1], [0], [0], [1], [0, 0, 1, 1], [], []>} : vector<4x4xbf16>, vector<4x286xbf16>, vector<4x286xf32> -> vector<4x286xf32>
    %9 = arith.addf %3, %8 : vector<4x286xf32>
    %c1 = arith.constant 1 : index
    %c0_8 = arith.constant 0 : index
    %c0_9 = arith.constant 0 : index
    %10 = vector.load %arg3[%c1, %c0_8, %c0_9] : memref<9x4x4xbf16, #tpu.memory_space<vmem>>, vector<1x4x4xbf16>
    %11 = vector.shape_cast %10 : vector<1x4x4xbf16> to vector<4x4xbf16>
    %c0_10 = arith.constant 0 : index
    %c0_11 = arith.constant 0 : index
    %c1_12 = arith.constant 1 : index
    %12 = vector.load %arg1[%c0_10, %c0_11, %c1_12] : memref<1x4x324xbf16, #tpu.memory_space<vmem>>, vector<1x4x286xbf16>
    %13 = vector.shape_cast %12 : vector<1x4x286xbf16> to vector<4x286xbf16>
    %cst_13 = arith.constant dense<0.000000e+00> : vector<4x286xf32>
    %14 = tpu.matmul %11, %13, %cst_13 {dimension_numbers = #tpu.dot_dimension_numbers<[1], [0], [0], [1], [0, 0, 1, 1], [], []>} : vector<4x4xbf16>, vector<4x286xbf16>, vector<4x286xf32> -> vector<4x286xf32>
    %15 = arith.addf %9, %14 : vector<4x286xf32>
    %c2 = arith.constant 2 : index
    %c0_14 = arith.constant 0 : index
    %c0_15 = arith.constant 0 : index
    %16 = vector.load %arg3[%c2, %c0_14, %c0_15] : memref<9x4x4xbf16, #tpu.memory_space<vmem>>, vector<1x4x4xbf16>
    %17 = vector.shape_cast %16 : vector<1x4x4xbf16> to vector<4x4xbf16>
    %c0_16 = arith.constant 0 : index
    %c0_17 = arith.constant 0 : index
    %c2_18 = arith.constant 2 : index
    %18 = vector.load %arg1[%c0_16, %c0_17, %c2_18] : memref<1x4x324xbf16, #tpu.memory_space<vmem>>, vector<1x4x286xbf16>
    %19 = vector.shape_cast %18 : vector<1x4x286xbf16> to vector<4x286xbf16>
    %cst_19 = arith.constant dense<0.000000e+00> : vector<4x286xf32>
    %20 = tpu.matmul %17, %19, %cst_19 {dimension_numbers = #tpu.dot_dimension_numbers<[1], [0], [0], [1], [0, 0, 1, 1], [], []>} : vector<4x4xbf16>, vector<4x286xbf16>, vector<4x286xf32> -> vector<4x286xf32>
    %21 = arith.addf %15, %20 : vector<4x286xf32>
    %c3 = arith.constant 3 : index
    %c0_20 = arith.constant 0 : index
    %c0_21 = arith.constant 0 : index
    %22 = vector.load %arg3[%c3, %c0_20, %c0_21] : memref<9x4x4xbf16, #tpu.memory_space<vmem>>, vector<1x4x4xbf16>
    %23 = vector.shape_cast %22 : vector<1x4x4xbf16> to vector<4x4xbf16>
    %c0_22 = arith.constant 0 : index
    %c0_23 = arith.constant 0 : index
    %c18 = arith.constant 18 : index
    %24 = vector.load %arg1[%c0_22, %c0_23, %c18] : memref<1x4x324xbf16, #tpu.memory_space<vmem>>, vector<1x4x286xbf16>
    %25 = vector.shape_cast %24 : vector<1x4x286xbf16> to vector<4x286xbf16>
    %cst_24 = arith.constant dense<0.000000e+00> : vector<4x286xf32>
    %26 = tpu.matmul %23, %25, %cst_24 {dimension_numbers = #tpu.dot_dimension_numbers<[1], [0], [0], [1], [0, 0, 1, 1], [], []>} : vector<4x4xbf16>, vector<4x286xbf16>, vector<4x286xf32> -> vector<4x286xf32>
    %27 = arith.addf %21, %26 : vector<4x286xf32>
    %c4 = arith.constant 4 : index
    %c0_25 = arith.constant 0 : index
    %c0_26 = arith.constant 0 : index
    %28 = vector.load %arg3[%c4, %c0_25, %c0_26] : memref<9x4x4xbf16, #tpu.memory_space<vmem>>, vector<1x4x4xbf16>
    %29 = vector.shape_cast %28 : vector<1x4x4xbf16> to vector<4x4xbf16>
    %c0_27 = arith.constant 0 : index
    %c0_28 = arith.constant 0 : index
    %c19 = arith.constant 19 : index
    %30 = vector.load %arg1[%c0_27, %c0_28, %c19] : memref<1x4x324xbf16, #tpu.memory_space<vmem>>, vector<1x4x286xbf16>
    %31 = vector.shape_cast %30 : vector<1x4x286xbf16> to vector<4x286xbf16>
    %cst_29 = arith.constant dense<0.000000e+00> : vector<4x286xf32>
    %32 = tpu.matmul %29, %31, %cst_29 {dimension_numbers = #tpu.dot_dimension_numbers<[1], [0], [0], [1], [0, 0, 1, 1], [], []>} : vector<4x4xbf16>, vector<4x286xbf16>, vector<4x286xf32> -> vector<4x286xf32>
    %33 = arith.addf %27, %32 : vector<4x286xf32>
    %c5 = arith.constant 5 : index
    %c0_30 = arith.constant 0 : index
    %c0_31 = arith.constant 0 : index
    %34 = vector.load %arg3[%c5, %c0_30, %c0_31] : memref<9x4x4xbf16, #tpu.memory_space<vmem>>, vector<1x4x4xbf16>
    %35 = vector.shape_cast %34 : vector<1x4x4xbf16> to vector<4x4xbf16>
    %c0_32 = arith.constant 0 : index
    %c0_33 = arith.constant 0 : index
    %c20 = arith.constant 20 : index
    %36 = vector.load %arg1[%c0_32, %c0_33, %c20] : memref<1x4x324xbf16, #tpu.memory_space<vmem>>, vector<1x4x286xbf16>
    %37 = vector.shape_cast %36 : vector<1x4x286xbf16> to vector<4x286xbf16>
    %cst_34 = arith.constant dense<0.000000e+00> : vector<4x286xf32>
    %38 = tpu.matmul %35, %37, %cst_34 {dimension_numbers = #tpu.dot_dimension_numbers<[1], [0], [0], [1], [0, 0, 1, 1], [], []>} : vector<4x4xbf16>, vector<4x286xbf16>, vector<4x286xf32> -> vector<4x286xf32>
    %39 = arith.addf %33, %38 : vector<4x286xf32>
    %c6 = arith.constant 6 : index
    %c0_35 = arith.constant 0 : index
    %c0_36 = arith.constant 0 : index
    %40 = vector.load %arg3[%c6, %c0_35, %c0_36] : memref<9x4x4xbf16, #tpu.memory_space<vmem>>, vector<1x4x4xbf16>
    %41 = vector.shape_cast %40 : vector<1x4x4xbf16> to vector<4x4xbf16>
    %c0_37 = arith.constant 0 : index
    %c0_38 = arith.constant 0 : index
    %c36 = arith.constant 36 : index
    %42 = vector.load %arg1[%c0_37, %c0_38, %c36] : memref<1x4x324xbf16, #tpu.memory_space<vmem>>, vector<1x4x286xbf16>
    %43 = vector.shape_cast %42 : vector<1x4x286xbf16> to vector<4x286xbf16>
    %cst_39 = arith.constant dense<0.000000e+00> : vector<4x286xf32>
    %44 = tpu.matmul %41, %43, %cst_39 {dimension_numbers = #tpu.dot_dimension_numbers<[1], [0], [0], [1], [0, 0, 1, 1], [], []>} : vector<4x4xbf16>, vector<4x286xbf16>, vector<4x286xf32> -> vector<4x286xf32>
    %45 = arith.addf %39, %44 : vector<4x286xf32>
    %c7 = arith.constant 7 : index
    %c0_40 = arith.constant 0 : index
    %c0_41 = arith.constant 0 : index
    %46 = vector.load %arg3[%c7, %c0_40, %c0_41] : memref<9x4x4xbf16, #tpu.memory_space<vmem>>, vector<1x4x4xbf16>
    %47 = vector.shape_cast %46 : vector<1x4x4xbf16> to vector<4x4xbf16>
    %c0_42 = arith.constant 0 : index
    %c0_43 = arith.constant 0 : index
    %c37 = arith.constant 37 : index
    %48 = vector.load %arg1[%c0_42, %c0_43, %c37] : memref<1x4x324xbf16, #tpu.memory_space<vmem>>, vector<1x4x286xbf16>
    %49 = vector.shape_cast %48 : vector<1x4x286xbf16> to vector<4x286xbf16>
    %cst_44 = arith.constant dense<0.000000e+00> : vector<4x286xf32>
    %50 = tpu.matmul %47, %49, %cst_44 {dimension_numbers = #tpu.dot_dimension_numbers<[1], [0], [0], [1], [0, 0, 1, 1], [], []>} : vector<4x4xbf16>, vector<4x286xbf16>, vector<4x286xf32> -> vector<4x286xf32>
    %51 = arith.addf %45, %50 : vector<4x286xf32>
    %c8 = arith.constant 8 : index
    %c0_45 = arith.constant 0 : index
    %c0_46 = arith.constant 0 : index
    %52 = vector.load %arg3[%c8, %c0_45, %c0_46] : memref<9x4x4xbf16, #tpu.memory_space<vmem>>, vector<1x4x4xbf16>
    %53 = vector.shape_cast %52 : vector<1x4x4xbf16> to vector<4x4xbf16>
    %c0_47 = arith.constant 0 : index
    %c0_48 = arith.constant 0 : index
    %c38 = arith.constant 38 : index
    %54 = vector.load %arg1[%c0_47, %c0_48, %c38] : memref<1x4x324xbf16, #tpu.memory_space<vmem>>, vector<1x4x286xbf16>
    %55 = vector.shape_cast %54 : vector<1x4x286xbf16> to vector<4x286xbf16>
    %cst_49 = arith.constant dense<0.000000e+00> : vector<4x286xf32>
    %56 = tpu.matmul %53, %55, %cst_49 {dimension_numbers = #tpu.dot_dimension_numbers<[1], [0], [0], [1], [0, 0, 1, 1], [], []>} : vector<4x4xbf16>, vector<4x286xbf16>, vector<4x286xf32> -> vector<4x286xf32>
    %57 = arith.addf %51, %56 : vector<4x286xf32>
    %c0_50 = arith.constant 0 : index
    %c0_51 = arith.constant 0 : index
    %58 = vector.load %arg4[%c0_50, %c0_51] : memref<4x1xf32, #tpu.memory_space<vmem>>, vector<4x1xf32>
    %59 = vector.broadcast %58 : vector<4x1xf32> to vector<4x286xf32>
    %60 = arith.addf %57, %59 : vector<4x286xf32>
    %cst_52 = arith.constant 0.000000e+00 : f32
    %61 = vector.shape_cast %2 : vector<1x286xi1> to vector<1x286xi1>
    %62 = vector.broadcast %61 : vector<1x286xi1> to vector<4x286xi1>
    %63 = vector.broadcast %cst_52 : f32 to vector<4x286xf32>
    %64 = arith.select %62, %60, %63 : vector<4x286xi1>, vector<4x286xf32>
    %cst_53 = arith.constant dense<0.000000e+00> : vector<4xf32>
    %65 = vector.multi_reduction <add>, %64, %cst_53 [1] : vector<4x286xf32> to vector<4xf32>
    %66 = vector.shape_cast %65 : vector<4xf32> to vector<4x1xf32>
    %67 = arith.mulf %60, %60 : vector<4x286xf32>
    %cst_54 = arith.constant 0.000000e+00 : f32
    %68 = vector.shape_cast %2 : vector<1x286xi1> to vector<1x286xi1>
    %69 = vector.broadcast %68 : vector<1x286xi1> to vector<4x286xi1>
    %70 = vector.broadcast %cst_54 : f32 to vector<4x286xf32>
    %71 = arith.select %69, %67, %70 : vector<4x286xi1>, vector<4x286xf32>
    %cst_55 = arith.constant dense<0.000000e+00> : vector<4xf32>
    %72 = vector.multi_reduction <add>, %71, %cst_55 [1] : vector<4x286xf32> to vector<4xf32>
    %73 = vector.shape_cast %72 : vector<4xf32> to vector<4x1xf32>
    %cst_56 = arith.constant 3.906250e-03 : f32
    %74 = vector.broadcast %cst_56 : f32 to vector<4x1xf32>
    %75 = arith.mulf %66, %74 : vector<4x1xf32>
    %cst_57 = arith.constant 3.906250e-03 : f32
    %76 = vector.broadcast %cst_57 : f32 to vector<4x1xf32>
    %77 = arith.mulf %73, %76 : vector<4x1xf32>
    %78 = arith.mulf %75, %75 : vector<4x1xf32>
    %79 = arith.subf %77, %78 : vector<4x1xf32>
    %cst_58 = arith.constant 0.000000e+00 : f32
    %80 = vector.broadcast %cst_58 : f32 to vector<4x1xf32>
    %81 = arith.maximumf %79, %80 : vector<4x1xf32>
    %82 = vector.broadcast %75 : vector<4x1xf32> to vector<4x286xf32>
    %83 = arith.subf %60, %82 : vector<4x286xf32>
    %cst_59 = arith.constant 9.99999974E-6 : f32
    %84 = vector.broadcast %cst_59 : f32 to vector<4x1xf32>
    %85 = arith.addf %81, %84 : vector<4x1xf32>
    %86 = math.rsqrt %85 : vector<4x1xf32>
    %87 = vector.broadcast %86 : vector<4x1xf32> to vector<4x286xf32>
    %88 = arith.mulf %83, %87 : vector<4x286xf32>
    %c0_60 = arith.constant 0 : index
    %c0_61 = arith.constant 0 : index
    %89 = vector.load %arg5[%c0_60, %c0_61] : memref<4x1xf32, #tpu.memory_space<vmem>>, vector<4x1xf32>
    %90 = vector.broadcast %89 : vector<4x1xf32> to vector<4x286xf32>
    %91 = arith.mulf %88, %90 : vector<4x286xf32>
    %c0_62 = arith.constant 0 : index
    %c0_63 = arith.constant 0 : index
    %92 = vector.load %arg6[%c0_62, %c0_63] : memref<4x1xf32, #tpu.memory_space<vmem>>, vector<4x1xf32>
    %93 = vector.broadcast %92 : vector<4x1xf32> to vector<4x286xf32>
    %94 = arith.addf %91, %93 : vector<4x286xf32>
    %cst_64 = arith.constant 0.000000e+00 : f32
    %95 = vector.broadcast %cst_64 : f32 to vector<4x286xf32>
    %96 = arith.maximumf %94, %95 : vector<4x286xf32>
    %97 = arith.truncf %96 : vector<4x286xf32> to vector<4x286xbf16>
    %cst_65 = arith.constant 0.000000e+00 : bf16
    %98 = vector.broadcast %cst_65 : bf16 to vector<4x324xbf16>
    %c0_66 = arith.constant 0 : index
    %c0_67 = arith.constant 0 : index
    %99 = vector.load %arg12[%c0_66, %c0_67] : memref<4x324xbf16, #tpu.memory_space<vmem>>, vector<4x324xbf16>
    tpu.vector_store %arg12[%c0_66, %c0_67], %98 {strides = array<i32>} : memref<4x324xbf16, #tpu.memory_space<vmem>>, vector<4x324xbf16>,
    %c0_68 = arith.constant 0 : index
    %c19_69 = arith.constant 19 : index
    %100 = vector.load %arg12[%c0_68, %c19_69] : memref<4x324xbf16, #tpu.memory_space<vmem>>, vector<4x286xbf16>
    tpu.vector_store %arg12[%c0_68, %c19_69], %97 {strides = array<i32>} : memref<4x324xbf16, #tpu.memory_space<vmem>>, vector<4x286xbf16>,
    %c0_70 = arith.constant 0 : index
    %c17 = arith.constant 17 : index
    %101 = vector.load %arg12[%c0_70, %c17] : memref<4x324xbf16, #tpu.memory_space<vmem>>, vector<4x286xbf16>
    %c1_i32 = arith.constant 1 : i32
    %102 = vector.broadcast %c1_i32 : i32 to vector<1x286xi32>
    %103 = arith.cmpi eq, %0, %102 : vector<1x286xi32>
    %104 = vector.shape_cast %103 : vector<1x286xi1> to vector<1x286xi1>
    %105 = vector.broadcast %104 : vector<1x286xi1> to vector<4x286xi1>
    %106 = arith.select %105, %97, %101 : vector<4x286xi1>, vector<4x286xbf16>
    %c0_71 = arith.constant 0 : index
    %c17_72 = arith.constant 17 : index
    %107 = vector.load %arg12[%c0_71, %c17_72] : memref<4x324xbf16, #tpu.memory_space<vmem>>, vector<4x286xbf16>
    tpu.vector_store %arg12[%c0_71, %c17_72], %106 {strides = array<i32>} : memref<4x324xbf16, #tpu.memory_space<vmem>>, vector<4x286xbf16>,
    %c0_73 = arith.constant 0 : index
    %c21 = arith.constant 21 : index
    %108 = vector.load %arg12[%c0_73, %c21] : memref<4x324xbf16, #tpu.memory_space<vmem>>, vector<4x286xbf16>
    %c14_i32 = arith.constant 14 : i32
    %109 = vector.broadcast %c14_i32 : i32 to vector<1x286xi32>
    %110 = arith.cmpi eq, %0, %109 : vector<1x286xi32>
    %111 = vector.shape_cast %110 : vector<1x286xi1> to vector<1x286xi1>
    %112 = vector.broadcast %111 : vector<1x286xi1> to vector<4x286xi1>
    %113 = arith.select %112, %97, %108 : vector<4x286xi1>, vector<4x286xbf16>
    %c0_74 = arith.constant 0 : index
    %c21_75 = arith.constant 21 : index
    %114 = vector.load %arg12[%c0_74, %c21_75] : memref<4x324xbf16, #tpu.memory_space<vmem>>, vector<4x286xbf16>
    tpu.vector_store %arg12[%c0_74, %c21_75], %113 {strides = array<i32>} : memref<4x324xbf16, #tpu.memory_space<vmem>>, vector<4x286xbf16>,
    %c0_76 = arith.constant 0 : index
    %c36_77 = arith.constant 36 : index
    %115 = vector.load %arg12[%c0_76, %c36_77] : memref<4x324xbf16, #tpu.memory_space<vmem>>, vector<4x18xbf16>
    %c0_78 = arith.constant 0 : index
    %c0_79 = arith.constant 0 : index
    %116 = vector.load %arg12[%c0_78, %c0_79] : memref<4x324xbf16, #tpu.memory_space<vmem>>, vector<4x18xbf16>
    tpu.vector_store %arg12[%c0_78, %c0_79], %115 {strides = array<i32>} : memref<4x324xbf16, #tpu.memory_space<vmem>>, vector<4x18xbf16>,
    %c0_80 = arith.constant 0 : index
    %c270 = arith.constant 270 : index
    %117 = vector.load %arg12[%c0_80, %c270] : memref<4x324xbf16, #tpu.memory_space<vmem>>, vector<4x18xbf16>
    %c0_81 = arith.constant 0 : index
    %c306 = arith.constant 306 : index
    %118 = vector.load %arg12[%c0_81, %c306] : memref<4x324xbf16, #tpu.memory_space<vmem>>, vector<4x18xbf16>
    tpu.vector_store %arg12[%c0_81, %c306], %117 {strides = array<i32>} : memref<4x324xbf16, #tpu.memory_space<vmem>>, vector<4x18xbf16>,
    %cst_82 = arith.constant 0.000000e+00 : f32
    %119 = vector.broadcast %cst_82 : f32 to vector<4x286xf32>
    %c0_83 = arith.constant 0 : index
    %c0_84 = arith.constant 0 : index
    %c0_85 = arith.constant 0 : index
    %120 = vector.load %arg7[%c0_83, %c0_84, %c0_85] : memref<9x4x4xbf16, #tpu.memory_space<vmem>>, vector<1x4x4xbf16>
    %121 = vector.shape_cast %120 : vector<1x4x4xbf16> to vector<4x4xbf16>
    %c0_86 = arith.constant 0 : index
    %c0_87 = arith.constant 0 : index
    %122 = vector.load %arg12[%c0_86, %c0_87] : memref<4x324xbf16, #tpu.memory_space<vmem>>, vector<4x286xbf16>
    %cst_88 = arith.constant dense<0.000000e+00> : vector<4x286xf32>
    %123 = tpu.matmul %121, %122, %cst_88 {dimension_numbers = #tpu.dot_dimension_numbers<[1], [0], [0], [1], [0, 0, 1, 1], [], []>} : vector<4x4xbf16>, vector<4x286xbf16>, vector<4x286xf32> -> vector<4x286xf32>
    %124 = arith.addf %119, %123 : vector<4x286xf32>
    %c1_89 = arith.constant 1 : index
    %c0_90 = arith.constant 0 : index
    %c0_91 = arith.constant 0 : index
    %125 = vector.load %arg7[%c1_89, %c0_90, %c0_91] : memref<9x4x4xbf16, #tpu.memory_space<vmem>>, vector<1x4x4xbf16>
    %126 = vector.shape_cast %125 : vector<1x4x4xbf16> to vector<4x4xbf16>
    %c0_92 = arith.constant 0 : index
    %c1_93 = arith.constant 1 : index
    %127 = vector.load %arg12[%c0_92, %c1_93] : memref<4x324xbf16, #tpu.memory_space<vmem>>, vector<4x286xbf16>
    %cst_94 = arith.constant dense<0.000000e+00> : vector<4x286xf32>
    %128 = tpu.matmul %126, %127, %cst_94 {dimension_numbers = #tpu.dot_dimension_numbers<[1], [0], [0], [1], [0, 0, 1, 1], [], []>} : vector<4x4xbf16>, vector<4x286xbf16>, vector<4x286xf32> -> vector<4x286xf32>
    %129 = arith.addf %124, %128 : vector<4x286xf32>
    %c2_95 = arith.constant 2 : index
    %c0_96 = arith.constant 0 : index
    %c0_97 = arith.constant 0 : index
    %130 = vector.load %arg7[%c2_95, %c0_96, %c0_97] : memref<9x4x4xbf16, #tpu.memory_space<vmem>>, vector<1x4x4xbf16>
    %131 = vector.shape_cast %130 : vector<1x4x4xbf16> to vector<4x4xbf16>
    %c0_98 = arith.constant 0 : index
    %c2_99 = arith.constant 2 : index
    %132 = vector.load %arg12[%c0_98, %c2_99] : memref<4x324xbf16, #tpu.memory_space<vmem>>, vector<4x286xbf16>
    %cst_100 = arith.constant dense<0.000000e+00> : vector<4x286xf32>
    %133 = tpu.matmul %131, %132, %cst_100 {dimension_numbers = #tpu.dot_dimension_numbers<[1], [0], [0], [1], [0, 0, 1, 1], [], []>} : vector<4x4xbf16>, vector<4x286xbf16>, vector<4x286xf32> -> vector<4x286xf32>
    %134 = arith.addf %129, %133 : vector<4x286xf32>
    %c3_101 = arith.constant 3 : index
    %c0_102 = arith.constant 0 : index
    %c0_103 = arith.constant 0 : index
    %135 = vector.load %arg7[%c3_101, %c0_102, %c0_103] : memref<9x4x4xbf16, #tpu.memory_space<vmem>>, vector<1x4x4xbf16>
    %136 = vector.shape_cast %135 : vector<1x4x4xbf16> to vector<4x4xbf16>
    %c0_104 = arith.constant 0 : index
    %c18_105 = arith.constant 18 : index
    %137 = vector.load %arg12[%c0_104, %c18_105] : memref<4x324xbf16, #tpu.memory_space<vmem>>, vector<4x286xbf16>
    %cst_106 = arith.constant dense<0.000000e+00> : vector<4x286xf32>
    %138 = tpu.matmul %136, %137, %cst_106 {dimension_numbers = #tpu.dot_dimension_numbers<[1], [0], [0], [1], [0, 0, 1, 1], [], []>} : vector<4x4xbf16>, vector<4x286xbf16>, vector<4x286xf32> -> vector<4x286xf32>
    %139 = arith.addf %134, %138 : vector<4x286xf32>
    %c4_107 = arith.constant 4 : index
    %c0_108 = arith.constant 0 : index
    %c0_109 = arith.constant 0 : index
    %140 = vector.load %arg7[%c4_107, %c0_108, %c0_109] : memref<9x4x4xbf16, #tpu.memory_space<vmem>>, vector<1x4x4xbf16>
    %141 = vector.shape_cast %140 : vector<1x4x4xbf16> to vector<4x4xbf16>
    %c0_110 = arith.constant 0 : index
    %c19_111 = arith.constant 19 : index
    %142 = vector.load %arg12[%c0_110, %c19_111] : memref<4x324xbf16, #tpu.memory_space<vmem>>, vector<4x286xbf16>
    %cst_112 = arith.constant dense<0.000000e+00> : vector<4x286xf32>
    %143 = tpu.matmul %141, %142, %cst_112 {dimension_numbers = #tpu.dot_dimension_numbers<[1], [0], [0], [1], [0, 0, 1, 1], [], []>} : vector<4x4xbf16>, vector<4x286xbf16>, vector<4x286xf32> -> vector<4x286xf32>
    %144 = arith.addf %139, %143 : vector<4x286xf32>
    %c5_113 = arith.constant 5 : index
    %c0_114 = arith.constant 0 : index
    %c0_115 = arith.constant 0 : index
    %145 = vector.load %arg7[%c5_113, %c0_114, %c0_115] : memref<9x4x4xbf16, #tpu.memory_space<vmem>>, vector<1x4x4xbf16>
    %146 = vector.shape_cast %145 : vector<1x4x4xbf16> to vector<4x4xbf16>
    %c0_116 = arith.constant 0 : index
    %c20_117 = arith.constant 20 : index
    %147 = vector.load %arg12[%c0_116, %c20_117] : memref<4x324xbf16, #tpu.memory_space<vmem>>, vector<4x286xbf16>
    %cst_118 = arith.constant dense<0.000000e+00> : vector<4x286xf32>
    %148 = tpu.matmul %146, %147, %cst_118 {dimension_numbers = #tpu.dot_dimension_numbers<[1], [0], [0], [1], [0, 0, 1, 1], [], []>} : vector<4x4xbf16>, vector<4x286xbf16>, vector<4x286xf32> -> vector<4x286xf32>
    %149 = arith.addf %144, %148 : vector<4x286xf32>
    %c6_119 = arith.constant 6 : index
    %c0_120 = arith.constant 0 : index
    %c0_121 = arith.constant 0 : index
    %150 = vector.load %arg7[%c6_119, %c0_120, %c0_121] : memref<9x4x4xbf16, #tpu.memory_space<vmem>>, vector<1x4x4xbf16>
    %151 = vector.shape_cast %150 : vector<1x4x4xbf16> to vector<4x4xbf16>
    %c0_122 = arith.constant 0 : index
    %c36_123 = arith.constant 36 : index
    %152 = vector.load %arg12[%c0_122, %c36_123] : memref<4x324xbf16, #tpu.memory_space<vmem>>, vector<4x286xbf16>
    %cst_124 = arith.constant dense<0.000000e+00> : vector<4x286xf32>
    %153 = tpu.matmul %151, %152, %cst_124 {dimension_numbers = #tpu.dot_dimension_numbers<[1], [0], [0], [1], [0, 0, 1, 1], [], []>} : vector<4x4xbf16>, vector<4x286xbf16>, vector<4x286xf32> -> vector<4x286xf32>
    %154 = arith.addf %149, %153 : vector<4x286xf32>
    %c7_125 = arith.constant 7 : index
    %c0_126 = arith.constant 0 : index
    %c0_127 = arith.constant 0 : index
    %155 = vector.load %arg7[%c7_125, %c0_126, %c0_127] : memref<9x4x4xbf16, #tpu.memory_space<vmem>>, vector<1x4x4xbf16>
    %156 = vector.shape_cast %155 : vector<1x4x4xbf16> to vector<4x4xbf16>
    %c0_128 = arith.constant 0 : index
    %c37_129 = arith.constant 37 : index
    %157 = vector.load %arg12[%c0_128, %c37_129] : memref<4x324xbf16, #tpu.memory_space<vmem>>, vector<4x286xbf16>
    %cst_130 = arith.constant dense<0.000000e+00> : vector<4x286xf32>
    %158 = tpu.matmul %156, %157, %cst_130 {dimension_numbers = #tpu.dot_dimension_numbers<[1], [0], [0], [1], [0, 0, 1, 1], [], []>} : vector<4x4xbf16>, vector<4x286xbf16>, vector<4x286xf32> -> vector<4x286xf32>
    %159 = arith.addf %154, %158 : vector<4x286xf32>
    %c8_131 = arith.constant 8 : index
    %c0_132 = arith.constant 0 : index
    %c0_133 = arith.constant 0 : index
    %160 = vector.load %arg7[%c8_131, %c0_132, %c0_133] : memref<9x4x4xbf16, #tpu.memory_space<vmem>>, vector<1x4x4xbf16>
    %161 = vector.shape_cast %160 : vector<1x4x4xbf16> to vector<4x4xbf16>
    %c0_134 = arith.constant 0 : index
    %c38_135 = arith.constant 38 : index
    %162 = vector.load %arg12[%c0_134, %c38_135] : memref<4x324xbf16, #tpu.memory_space<vmem>>, vector<4x286xbf16>
    %cst_136 = arith.constant dense<0.000000e+00> : vector<4x286xf32>
    %163 = tpu.matmul %161, %162, %cst_136 {dimension_numbers = #tpu.dot_dimension_numbers<[1], [0], [0], [1], [0, 0, 1, 1], [], []>} : vector<4x4xbf16>, vector<4x286xbf16>, vector<4x286xf32> -> vector<4x286xf32>
    %164 = arith.addf %159, %163 : vector<4x286xf32>
    %c0_137 = arith.constant 0 : index
    %c0_138 = arith.constant 0 : index
    %165 = vector.load %arg8[%c0_137, %c0_138] : memref<4x1xf32, #tpu.memory_space<vmem>>, vector<4x1xf32>
    %166 = vector.broadcast %165 : vector<4x1xf32> to vector<4x286xf32>
    %167 = arith.addf %164, %166 : vector<4x286xf32>
    %cst_139 = arith.constant 0.000000e+00 : f32
    %168 = vector.shape_cast %2 : vector<1x286xi1> to vector<1x286xi1>
    %169 = vector.broadcast %168 : vector<1x286xi1> to vector<4x286xi1>
    %170 = vector.broadcast %cst_139 : f32 to vector<4x286xf32>
    %171 = arith.select %169, %167, %170 : vector<4x286xi1>, vector<4x286xf32>
    %cst_140 = arith.constant dense<0.000000e+00> : vector<4xf32>
    %172 = vector.multi_reduction <add>, %171, %cst_140 [1] : vector<4x286xf32> to vector<4xf32>
    %173 = vector.shape_cast %172 : vector<4xf32> to vector<4x1xf32>
    %174 = arith.mulf %167, %167 : vector<4x286xf32>
    %cst_141 = arith.constant 0.000000e+00 : f32
    %175 = vector.shape_cast %2 : vector<1x286xi1> to vector<1x286xi1>
    %176 = vector.broadcast %175 : vector<1x286xi1> to vector<4x286xi1>
    %177 = vector.broadcast %cst_141 : f32 to vector<4x286xf32>
    %178 = arith.select %176, %174, %177 : vector<4x286xi1>, vector<4x286xf32>
    %cst_142 = arith.constant dense<0.000000e+00> : vector<4xf32>
    %179 = vector.multi_reduction <add>, %178, %cst_142 [1] : vector<4x286xf32> to vector<4xf32>
    %180 = vector.shape_cast %179 : vector<4xf32> to vector<4x1xf32>
    %cst_143 = arith.constant 3.906250e-03 : f32
    %181 = vector.broadcast %cst_143 : f32 to vector<4x1xf32>
    %182 = arith.mulf %173, %181 : vector<4x1xf32>
    %cst_144 = arith.constant 3.906250e-03 : f32
    %183 = vector.broadcast %cst_144 : f32 to vector<4x1xf32>
    %184 = arith.mulf %180, %183 : vector<4x1xf32>
    %185 = arith.mulf %182, %182 : vector<4x1xf32>
    %186 = arith.subf %184, %185 : vector<4x1xf32>
    %cst_145 = arith.constant 0.000000e+00 : f32
    %187 = vector.broadcast %cst_145 : f32 to vector<4x1xf32>
    %188 = arith.maximumf %186, %187 : vector<4x1xf32>
    %189 = vector.broadcast %182 : vector<4x1xf32> to vector<4x286xf32>
    %190 = arith.subf %167, %189 : vector<4x286xf32>
    %cst_146 = arith.constant 9.99999974E-6 : f32
    %191 = vector.broadcast %cst_146 : f32 to vector<4x1xf32>
    %192 = arith.addf %188, %191 : vector<4x1xf32>
    %193 = math.rsqrt %192 : vector<4x1xf32>
    %194 = vector.broadcast %193 : vector<4x1xf32> to vector<4x286xf32>
    %195 = arith.mulf %190, %194 : vector<4x286xf32>
    %c0_147 = arith.constant 0 : index
    %c0_148 = arith.constant 0 : index
    %196 = vector.load %arg9[%c0_147, %c0_148] : memref<4x1xf32, #tpu.memory_space<vmem>>, vector<4x1xf32>
    %197 = vector.broadcast %196 : vector<4x1xf32> to vector<4x286xf32>
    %198 = arith.mulf %195, %197 : vector<4x286xf32>
    %c0_149 = arith.constant 0 : index
    %c0_150 = arith.constant 0 : index
    %199 = vector.load %arg10[%c0_149, %c0_150] : memref<4x1xf32, #tpu.memory_space<vmem>>, vector<4x1xf32>
    %200 = vector.broadcast %199 : vector<4x1xf32> to vector<4x286xf32>
    %201 = arith.addf %198, %200 : vector<4x286xf32>
    %c0_151 = arith.constant 0 : index
    %c0_152 = arith.constant 0 : index
    %c19_153 = arith.constant 19 : index
    %202 = vector.load %arg1[%c0_151, %c0_152, %c19_153] : memref<1x4x324xbf16, #tpu.memory_space<vmem>>, vector<1x4x286xbf16>
    %203 = vector.shape_cast %202 : vector<1x4x286xbf16> to vector<4x286xbf16>
    %204 = arith.extf %203 : vector<4x286xbf16> to vector<4x286xf32>
    %205 = arith.addf %201, %204 : vector<4x286xf32>
    %c0_154 = arith.constant 0 : index
    %c0_155 = arith.constant 0 : index
    %c0_156 = arith.constant 0 : index
    %206 = vector.load %arg11[%c0_154, %c0_155, %c0_156] : memref<1x4x286xf32, #tpu.memory_space<vmem>>, vector<1x4x286xf32>
    %207 = vector.shape_cast %206 : vector<1x4x286xf32> to vector<4x286xf32>
    %208 = vector.shape_cast %205 : vector<4x286xf32> to vector<1x4x286xf32>
    tpu.vector_store %arg11[%c0_154, %c0_155, %c0_156], %208 {strides = array<i32>} : memref<1x4x286xf32, #tpu.memory_space<vmem>>, vector<1x4x286xf32>,
    return
  }
  func.func @transform_0(%arg0: i32) -> (i32, i32, i32) {
    %c0_i32 = arith.constant 0 : i32
    %c0_i32_0 = arith.constant 0 : i32
    %c0_i32_1 = arith.constant 0 : i32
    return %arg0, %c0_i32, %c0_i32_0 : i32, i32, i32
  }
  func.func @transform_1(%arg0: i32) -> (i32, i32) {
    %c0_i32 = arith.constant 0 : i32
    %c0_i32_0 = arith.constant 0 : i32
    %c0_i32_1 = arith.constant 0 : i32
    return %c0_i32, %c0_i32_0 : i32, i32
  }
  func.func @transform_2(%arg0: i32) -> (i32, i32, i32) {
    %c0_i32 = arith.constant 0 : i32
    %c0_i32_0 = arith.constant 0 : i32
    %c0_i32_1 = arith.constant 0 : i32
    %c0_i32_2 = arith.constant 0 : i32
    return %c0_i32, %c0_i32_0, %c0_i32_1 : i32, i32, i32
  }
  func.func @transform_3(%arg0: i32) -> (i32, i32) {
    %c0_i32 = arith.constant 0 : i32
    %c0_i32_0 = arith.constant 0 : i32
    %c0_i32_1 = arith.constant 0 : i32
    return %c0_i32, %c0_i32_0 : i32, i32
  }
  func.func @transform_4(%arg0: i32) -> (i32, i32) {
    %c0_i32 = arith.constant 0 : i32
    %c0_i32_0 = arith.constant 0 : i32
    %c0_i32_1 = arith.constant 0 : i32
    return %c0_i32, %c0_i32_0 : i32, i32
  }
  func.func @transform_5(%arg0: i32) -> (i32, i32) {
    %c0_i32 = arith.constant 0 : i32
    %c0_i32_0 = arith.constant 0 : i32
    %c0_i32_1 = arith.constant 0 : i32
    return %c0_i32, %c0_i32_0 : i32, i32
  }
  func.func @transform_6(%arg0: i32) -> (i32, i32, i32) {
    %c0_i32 = arith.constant 0 : i32
    %c0_i32_0 = arith.constant 0 : i32
    %c0_i32_1 = arith.constant 0 : i32
    %c0_i32_2 = arith.constant 0 : i32
    return %c0_i32, %c0_i32_0, %c0_i32_1 : i32, i32, i32
  }
  func.func @transform_7(%arg0: i32) -> (i32, i32) {
    %c0_i32 = arith.constant 0 : i32
    %c0_i32_0 = arith.constant 0 : i32
    %c0_i32_1 = arith.constant 0 : i32
    return %c0_i32, %c0_i32_0 : i32, i32
  }
  func.func @transform_8(%arg0: i32) -> (i32, i32) {
    %c0_i32 = arith.constant 0 : i32
    %c0_i32_0 = arith.constant 0 : i32
    %c0_i32_1 = arith.constant 0 : i32
    return %c0_i32, %c0_i32_0 : i32, i32
  }
  func.func @transform_9(%arg0: i32) -> (i32, i32) {
    %c0_i32 = arith.constant 0 : i32
    %c0_i32_0 = arith.constant 0 : i32
    %c0_i32_1 = arith.constant 0 : i32
    return %c0_i32, %c0_i32_0 : i32, i32
  }
  func.func @transform_10(%arg0: i32) -> (i32, i32, i32) {
    %c0_i32 = arith.constant 0 : i32
    %c0_i32_0 = arith.constant 0 : i32
    %c0_i32_1 = arith.constant 0 : i32
    return %arg0, %c0_i32, %c0_i32_0 : i32, i32, i32
  }
}

</mosaic_0001>

<bundles_post_ra>
// kernel: residual_block_forward.1
= control target key start
LH: loop header
LB: loop body
LE: loop exit
PB: predicated region body
PF: predicated region fallthrough
CT: control target
= control target key end

     0   :  { %s3382_s13 = smov 0   ;;  %s3908_s0 = inlined_call_operand.vmem [shape: bf16[2,4,324], index: 0, kind: input, shape index: {}]   ;;  %s3909_s1 = inlined_call_operand.vmem [shape: s32[1,286], index: 1, kind: input, shape index: {}]   ;;  %s3910_s2 = inlined_call_operand.vmem [shape: bf16[9,4,4], index: 2, kind: input, shape index: {}]   ;;  %s3911_s3 = inlined_call_operand.vmem [shape: f32[4,1], index: 3, kind: input, shape index: {}]   ;;  %s3912_s4 = inlined_call_operand.vmem [shape: f32[4,1], index: 4, kind: input, shape index: {}]   ;;  %s3913_s5 = inlined_call_operand.vmem [shape: f32[4,1], index: 5, kind: input, shape index: {}]   ;;  %s3914_s6 = inlined_call_operand.vmem [shape: bf16[9,4,4], index: 6, kind: input, shape index: {}]   ;;  %s3915_s7 = inlined_call_operand.vmem [shape: f32[4,1], index: 7, kind: input, shape index: {}]   ;;  %s3916_s8 = inlined_call_operand.vmem [shape: f32[4,1], index: 8, kind: input, shape index: {}]   ;;  %s3917_s9 = inlined_call_operand.vmem [shape: f32[4,1], index: 9, kind: input, shape index: {}]   ;;  %s3918_s10 = inlined_call_operand.vmem [shape: f32[2,4,286], index: 10, kind: output, shape index: {}]  }
   0x1 LB: > { %s3020_s14 = sadd.s32 4294967295, %s3307_s13   ;;  %p3024_p0 = scmp.ge.s32.totalorder %s3307_s13, 1  ;;  %s3307_s13 = sphi %s3382_s13, %s20_s13  }
   0x2   : > { %p312_p1 = scmp.lt.s32.totalorder %s3307_s13, 3 }
   0x4   : > { %p313_p2 = pnand %p3024_p0, %p312_p1 }
   0x5   : > { %p350_p3 = scmp.lt.s32.totalorder (!%p313_p2), %s3020_s14, 1  ;;  %s3313_s19 = smov (!%p313_p2), 127  }
   0x6   : > { %316 = sbr.rel (%p313_p2) target bundleno = 1917 (0x77d), region = 60  ;;  %s3314_s20 = smov (!%p313_p2), 126  }
   0x7   : > { %s3315_s21 = smov (!%p313_p2), 110   ;;  %s3316_s22 = smov (!%p313_p2), 109  }
   0x8   : > { %s3317_s23 = smov (!%p313_p2), 108   ;;  %s3318_s24 = smov (!%p313_p2), 92  }
   0x9   : > { %s3319_s25 = smov (!%p313_p2), 91   ;;  %s3320_s26 = smov (!%p313_p2), 90  }
   0xa   : > { %s3321_s17 = smov (!%p313_p2), 19   ;;  %s3322_s27 = smov (!%p313_p2), 111  }
   0xb   : > { %v374_v0 = vlaneseq  ;;  %v3309_v1 = vmov 1983009808   ;;  %v3310_v3 = vmov 0.0   ;;  %s3961_s14 = smov (!%p350_p3, %s3020_s14), 1  ;;  %vm3927_vm0 = vmmov 0   ;;  %s3323_s28 = smov 17  }
   0xc   : > { %v372_v2 = vunpack.c.l.s4 %v3309_v1  ;;  %3136 = vmatprep.subr.bf16.mxu1 %v3310_v3  ;;  %3138 = vmatprep.mubr.msk.bf16.mxu1 %vm3927_vm0, %v3310_v3  ;;  %s3244_s15 = smul.u32 6, %s3961_s14  ;;  %v3312_v6 = vmov 0   ;;  %v1458_v48 = vld [vmem:[%s3911_s3] sm:$0xf]  ;;  %vm399_vm1 = vcmask 1041408   ;;  %vm392_vm2 = vcmask 1039360  }
   0xd   : > { %v3393_v4 = vshrl.u32 %v374_v0, 7  ;;  %441 = vmatprep.mubr.bf16.mxu0 %v3312_v6  ;;  %3272 = vset.pattern.permute.xlu0 %v3312_v6  ;;  %v3027_v53 = vld [vmem:[%s3910_s2 + $0x2] sm:$0x3]  ;;  %vm395_vm3 = vcmask 31744   ;;  %vm3929_vm4 = vcmask 1031168   ;;  %vm3926_vm5 = vcmask 900096  }
   0xe   : > { %v373_v5 = vunpack.c.0.s8 %v372_v2  ;;  %3273 = vset.pattern.permute.xlu1 %v3312_v6  ;;  %s3407_s18 = scalar_lea.vmem %s3908_s0, %s3244_s15  ;;  %v365_v63 = vld [vmem:[%s3910_s2] sm:$0x3]  ;;  %vm3925_vm6 = vcmask 891904   ;;  %vm3924_vm7 = vcmask 883712   ;;  %vm3922_vm8 = vcmask 752640   ;;  %s3324_s29 = smov 107  }
   0xf   : > { %v366_v8 = vld [vmem:[%s3407_s18] sm:$0x3f]  ;;  %vm3920_vm9 = vcmask 744448   ;;  %vm3919_vm10 = vcmask 736256   ;;  %vm3921_vm15 = vcmask 1043456   ;;  %s3325_s30 = smov 21  }
  0x10   : > { %v3401_v7 = vsub.s32 %v373_v5, %v3393_v4  ;;  %v370_v10 = vcombine.high %v366_v8, %v366_v8  ;;  %v585_v11 = vld [vmem:[%s3407_s18] sm:$0x3f]  ;;  %s3326_s11 = smov 36  }
  0x11   : > { %v587_v15 = vcombine.high %v585_v11, %v585_v11  ;;  %v710_v17 = vld [vmem:[%s3407_s18] sm:$0x3f] }
  0x12   : > { %v3411_v9 = vrot.slane %v366_v8, %v3401_v7  ;;  %v3417_v12 = vrot.slane %v370_v10, %v3401_v7  ;;  %v594_v14 = vrot.slane %v585_v11, %v3401_v7  ;;  %v719_v19 = vrot.slane %v710_v17, %v3401_v7  ;;  %v835_v22 = vld [vmem:[%s3407_s18] sm:$0x3f] }
  0x13   : > { %v601_v18 = vrot.slane %v587_v15, %v3401_v7  ;;  %v712_v20 = vcombine.high %v710_v17, %v710_v17  ;;  %v844_v24 = vrot.slane %v835_v22, %v3401_v7  ;;  %v837_v25 = vcombine.high %v835_v22, %v835_v22  ;;  %v960_v27 = vld [vmem:[%s3407_s18] sm:$0x3f] }
  0x14   : > { %386 = vrot.lane.b32.xlu0 %v3411_v9, %s3313_s19  ;;  %v3421_v13 = vcombine.high %v3411_v9, %v3411_v9  ;;  %390 = vrot.lane.b32.xlu1 %v3417_v12, %s3313_s19  ;;  %v602_v16 = vcombine.high %v594_v14, %v594_v14  ;;  %v727_v21 = vcombine.high %v719_v19, %v719_v19  ;;  %v1085_v32 = vld [vmem:[%s3407_s18] sm:$0x3f]  ;;  %v500_v56 = vsel %vm399_vm1, %v3417_v12, 0 }
  0x15   : > { %v726_v23 = vrot.slane %v712_v20, %v3401_v7  ;;  %v852_v26 = vcombine.high %v844_v24, %v844_v24  ;;  %v851_v28 = vrot.slane %v837_v25, %v3401_v7  ;;  %v969_v29 = vrot.slane %v960_v27, %v3401_v7  ;;  %v1210_v37 = vld [vmem:[%s3407_s18] sm:$0x3f] }
  0x16   : > { %v962_v30 = vcombine.high %v960_v27, %v960_v27  ;;  %v1094_v34 = vrot.slane %v1085_v32, %v3401_v7  ;;  %v1087_v35 = vcombine.high %v1085_v32, %v1085_v32  ;;  %v1219_v39 = vrot.slane %v1210_v37, %v3401_v7  ;;  %v1335_v42 = vld [vmem:[%s3407_s18] sm:$0x3f] }
  0x17   : > { %v977_v31 = vcombine.high %v969_v29, %v969_v29  ;;  %v1212_v40 = vcombine.high %v1210_v37, %v1210_v37  ;;  %v1344_v44 = vrot.slane %v1335_v42, %v3401_v7  ;;  %v1337_v45 = vcombine.high %v1335_v42, %v1335_v42  ;;  %v3034_v12 = vld [vmem:[%s3910_s2 + $0x4] sm:$0x3]  ;;  %v3046_v37 = vld [vmem:[%s3910_s2 + $0xa] sm:$0x3] }
  0x18   : > { %388 = vrot.lane.b32.xlu0 %v3421_v13, %s3313_s19  ;;  %603 = vrot.lane.b32.xlu1 %v594_v14, %s3314_s20  ;;  %v976_v33 = vrot.slane %v962_v30, %v3401_v7  ;;  %v1102_v36 = vcombine.high %v1094_v34, %v1094_v34  ;;  %v1101_v38 = vrot.slane %v1087_v35, %v3401_v7  ;;  %v494_v59 = vsel %vm399_vm1, %v3411_v9, 0 }
  0x19   : > { %v1227_v41 = vcombine.high %v1219_v39, %v1219_v39  ;;  %v1226_v43 = vrot.slane %v1212_v40, %v3401_v7  ;;  %v1352_v46 = vcombine.high %v1344_v44, %v1344_v44  ;;  %v1351_v47 = vrot.slane %v1337_v45, %v3401_v7 }
  0x1c   : > { %605 = vrot.lane.b32.xlu0 %v602_v16, %s3314_s20  ;;  %607 = vrot.lane.b32.xlu1 %v601_v18, %s3314_s20 }
  0x20   : > { %728 = vrot.lane.b32.xlu0 %v719_v19, %s3315_s21  ;;  %730 = vrot.lane.b32.xlu1 %v727_v21, %s3315_s21  ;;  %v3038_v21 = vld [vmem:[%s3910_s2 + $0x6] sm:$0x3] }
  0x24   : > { %732 = vrot.lane.b32.xlu0 %v726_v23, %s3315_s21  ;;  %853 = vrot.lane.b32.xlu1 %v844_v24, %s3316_s22 }
  0x28   : > { %855 = vrot.lane.b32.xlu0 %v852_v26, %s3316_s22  ;;  %857 = vrot.lane.b32.xlu1 %v851_v28, %s3316_s22 }
  0x2c   : > { %978 = vrot.lane.b32.xlu0 %v969_v29, %s3317_s23  ;;  %980 = vrot.lane.b32.xlu1 %v977_v31, %s3317_s23  ;;  %v3042_v29 = vld [vmem:[%s3910_s2 + $0x8] sm:$0x3] }
  0x30   : > { %982 = vrot.lane.b32.xlu0 %v976_v33, %s3317_s23  ;;  %1103 = vrot.lane.b32.xlu1 %v1094_v34, %s3318_s24 }
  0x34   : > { %1105 = vrot.lane.b32.xlu0 %v1102_v36, %s3318_s24  ;;  %1107 = vrot.lane.b32.xlu1 %v1101_v38, %s3318_s24 }
  0x38   : > { %1228 = vrot.lane.b32.xlu0 %v1219_v39, %s3319_s25  ;;  %1230 = vrot.lane.b32.xlu1 %v1227_v41, %s3319_s25 }
  0x3c   : > { %1232 = vrot.lane.b32.xlu0 %v1226_v43, %s3319_s25  ;;  %1353 = vrot.lane.b32.xlu1 %v1344_v44, %s3320_s26  ;;  %v3050_v44 = vld [vmem:[%s3910_s2 + $0xc] sm:$0x3] }
  0x40   : > { %1355 = vrot.lane.b32.xlu0 %v1352_v46, %s3320_s26  ;;  %1357 = vrot.lane.b32.xlu1 %v1351_v47, %s3320_s26 }
  0x44   : > { %1461 = vperm.xlu0 %3272, %v1458_v48  }
  0x86   : > { %v387_v49 = vpop.permute.xlu0 %386  ;;  %v391_v50 = vpop.permute.xlu1 %390 }
  0x87   : > { %v407_v51 = vsel %vm399_vm1, %v391_v50, 0 }
  0x88   : > { %3137 = vmatpush3.bf16.msra.mxu1 %v407_v51  ;;  %v3054_v51 = vld [vmem:[%s3910_s2 + $0xe] sm:$0x3] }
  0x89   : > { %3142 = vmatprep.subr.bf16.mxu1 %v3310_v3 }
  0x8a   : > { %v389_v52 = vpop.permute.xlu0 %388  ;;  %v604_v58 = vpop.permute.xlu1 %603 }
  0x8b   : > { %v394_v54 = vsel %vm392_vm2, %v389_v52, %v391_v50  ;;  %v393_v55 = vsel %vm392_vm2, %v387_v49, %v389_v52  ;;  %3139 = vmatmul.mubr.msk.bf16.vlgmr.msra.gmra.mxu1 %vm395_vm3, %v3027_v53 }
  0x8c   : > { %3028 = vmatprep.subr.msk.bf16.mxu0 %vm399_vm1, %v394_v54  ;;  %v401_v57 = vsel %vm399_vm1, %v393_v55, 0  ;;  %3143 = vmatpush3.bf16.msra.mxu1 %v500_v56  ;;  %v3058_v55 = vld [vmem:[%s3910_s2 + $0x10] sm:$0x3] }
  0x8d   : > { %424 = vmatpush1.bf16.msra.mxu0 %v401_v57  ;;  %3144 = vmatprep.mubr.msk.bf16.mxu1 %vm3927_vm0, %v3310_v3 }
  0x8e   : > { %3031 = vmatprep.subr.msk.bf16.mxu0 %vm399_vm1, %v3421_v13  ;;  %v606_v60 = vpop.permute.xlu0 %605  ;;  %3148 = vmatprep.subr.bf16.mxu1 %v3310_v3  ;;  %v608_v61 = vpop.permute.xlu1 %607 }
  0x8f   : > { %v611_v62 = vsel %vm3929_vm4, %v606_v60, %v608_v61  ;;  %v610_v1 = vsel %vm3929_vm4, %v604_v58, %v606_v60  ;;  %v622_v2 = vsel %vm399_vm1, %v608_v61, 0 }
  0x90   : > { %3029 = vmatmul.mubr.msk.bf16.vlgmr.msra.gmra.mxu0 %vm395_vm3, %v3027_v53  ;;  %v616_v8 = vsel %vm399_vm1, %v610_v1, 0 }
  0x91   : > { %517 = vmatpush1.bf16.msra.mxu0 %v494_v59  ;;  %534 = vmatprep.mubr.bf16.mxu0 %v3312_v6 }
  0x92   : > { %3035 = vmatprep.subr.msk.bf16.mxu0 %vm399_vm1, %v611_v62  ;;  %v729_v0 = vpop.permute.xlu0 %728  ;;  %v731_v5 = vpop.permute.xlu1 %730 }
  0x93   : > { %3145 = vmatmul.mubr.msk.bf16.vlgmr.msra.gmra.mxu1 %vm395_vm3, %v365_v63  ;;  %v735_v15 = vsel %vm3926_vm5, %v729_v0, %v731_v5 }
  0x94   : > { %3149 = vmatpush3.bf16.msra.mxu1 %v622_v2  ;;  %3150 = vmatprep.mubr.msk.bf16.mxu1 %vm3927_vm0, %v3310_v3  ;;  %v741_v17 = vsel %vm399_vm1, %v735_v15, 0 }
  0x95   : > { %3154 = vmatprep.subr.bf16.mxu1 %v3310_v3 }
  0x96   : > { %v733_v9 = vpop.permute.xlu0 %732  ;;  %v854_v11 = vpop.permute.xlu1 %853 }
  0x97   : > { %v736_v10 = vsel %vm3926_vm5, %v731_v5, %v733_v9  ;;  %v747_v14 = vsel %vm399_vm1, %v733_v9, 0 }
  0x98   : > { %3032 = vmatmul.mubr.msk.bf16.vlgmr.msra.gmra.mxu0 %vm395_vm3, %v365_v63 }
  0x99   : > { %639 = vmatpush1.bf16.msra.mxu0 %v616_v8  ;;  %656 = vmatprep.mubr.bf16.mxu0 %v3312_v6 }
  0x9a   : > { %3039 = vmatprep.subr.msk.bf16.mxu0 %vm399_vm1, %v736_v10  ;;  %v856_v13 = vpop.permute.xlu0 %855  ;;  %v858_v16 = vpop.permute.xlu1 %857 }
  0x9b   : > { %3151 = vmatmul.mubr.msk.bf16.vlgmr.msra.gmra.mxu1 %vm395_vm3, %v3034_v12  ;;  %v861_v19 = vsel %vm3925_vm6, %v856_v13, %v858_v16  ;;  %v860_v22 = vsel %vm3925_vm6, %v854_v11, %v856_v13  ;;  %v872_v23 = vsel %vm399_vm1, %v858_v16, 0 }
  0x9c   : > { %3155 = vmatpush3.bf16.msra.mxu1 %v747_v14  ;;  %3156 = vmatprep.mubr.msk.bf16.mxu1 %vm3927_vm0, %v3310_v3  ;;  %v866_v25 = vsel %vm399_vm1, %v860_v22, 0 }
  0x9d   : > { %3160 = vmatprep.subr.bf16.mxu1 %v3310_v3 }
  0x9e   : > { %v979_v18 = vpop.permute.xlu0 %978  ;;  %v981_v20 = vpop.permute.xlu1 %980 }
  0x9f   : > { %v985_v31 = vsel %vm3924_vm7, %v979_v18, %v981_v20 }
  0xa0   : > { %3036 = vmatmul.mubr.msk.bf16.vlgmr.msra.gmra.mxu0 %vm395_vm3, %v3034_v12  ;;  %v991_v33 = vsel %vm399_vm1, %v985_v31, 0 }
  0xa1   : > { %764 = vmatpush1.bf16.msra.mxu0 %v741_v17  ;;  %781 = vmatprep.mubr.bf16.mxu0 %v3312_v6 }
  0xa2   : > { %3043 = vmatprep.subr.msk.bf16.mxu0 %vm399_vm1, %v861_v19  ;;  %v983_v24 = vpop.permute.xlu0 %982  ;;  %v1104_v26 = vpop.permute.xlu1 %1103 }
  0xa3   : > { %3157 = vmatmul.mubr.msk.bf16.vlgmr.msra.gmra.mxu1 %vm395_vm3, %v3038_v21  ;;  %v986_v27 = vsel %vm3924_vm7, %v981_v20, %v983_v24  ;;  %v997_v30 = vsel %vm399_vm1, %v983_v24, 0 }
  0xa4   : > { %3161 = vmatpush3.bf16.msra.mxu1 %v872_v23  ;;  %3162 = vmatprep.mubr.msk.bf16.mxu1 %vm3927_vm0, %v3310_v3 }
  0xa5   : > { %3166 = vmatprep.subr.bf16.mxu1 %v3310_v3 }
  0xa6   : > { %v1106_v28 = vpop.permute.xlu0 %1105  ;;  %v1108_v32 = vpop.permute.xlu1 %1107 }
  0xa7   : > { %v1111_v35 = vsel %vm3922_vm8, %v1106_v28, %v1108_v32  ;;  %v1110_v38 = vsel %vm3922_vm8, %v1104_v26, %v1106_v28  ;;  %v1122_v39 = vsel %vm399_vm1, %v1108_v32, 0 }
  0xa8   : > { %3040 = vmatmul.mubr.msk.bf16.vlgmr.msra.gmra.mxu0 %vm395_vm3, %v3038_v21  ;;  %v1116_v41 = vsel %vm399_vm1, %v1110_v38, 0 }
  0xa9   : > { %889 = vmatpush1.bf16.msra.mxu0 %v866_v25  ;;  %906 = vmatprep.mubr.bf16.mxu0 %v3312_v6 }
  0xaa   : > { %3047 = vmatprep.subr.msk.bf16.mxu0 %vm399_vm1, %v986_v27  ;;  %v1229_v34 = vpop.permute.xlu0 %1228  ;;  %v1231_v36 = vpop.permute.xlu1 %1230 }
  0xab   : > { %3163 = vmatmul.mubr.msk.bf16.vlgmr.msra.gmra.mxu1 %vm395_vm3, %v3042_v29  ;;  %v1235_v46 = vsel %vm3920_vm9, %v1229_v34, %v1231_v36 }
  0xac   : > { %3167 = vmatpush3.bf16.msra.mxu1 %v997_v30  ;;  %3168 = vmatprep.mubr.msk.bf16.mxu1 %vm3927_vm0, %v3310_v3  ;;  %v1241_v49 = vsel %vm399_vm1, %v1235_v46, 0 }
  0xad   : > { %3172 = vmatprep.subr.bf16.mxu1 %v3310_v3 }
  0xae   : > { %v1233_v40 = vpop.permute.xlu0 %1232  ;;  %v1354_v42 = vpop.permute.xlu1 %1353 }
  0xaf   : > { %v1236_v43 = vsel %vm3920_vm9, %v1231_v36, %v1233_v40  ;;  %v1247_v45 = vsel %vm399_vm1, %v1233_v40, 0  ;;  %vm1547_vm9 = vcmask 553988  }
  0xb0   : > { %3044 = vmatmul.mubr.msk.bf16.vlgmr.msra.gmra.mxu0 %vm395_vm3, %v3042_v29 }
  0xb1   : > { %1014 = vmatpush1.bf16.msra.mxu0 %v991_v33  ;;  %1031 = vmatprep.mubr.bf16.mxu0 %v3312_v6 }
  0xb2   : > { %3051 = vmatprep.subr.msk.bf16.mxu0 %vm399_vm1, %v1111_v35  ;;  %v1356_v47 = vpop.permute.xlu0 %1355  ;;  %v1358_v48 = vpop.permute.xlu1 %1357 }
  0xb3   : > { %3169 = vmatmul.mubr.msk.bf16.vlgmr.msra.gmra.mxu1 %vm395_vm3, %v3046_v37  ;;  %v1361_v50 = vsel %vm3919_vm10, %v1356_v47, %v1358_v48  ;;  %v1360_v52 = vsel %vm3919_vm10, %v1354_v42, %v1356_v47  ;;  %v1372_v53 = vsel %vm399_vm1, %v1358_v48, 0  ;;  %vm1545_vm10 = vcmask 1043458  }
  0xb4   : > { %3173 = vmatpush3.bf16.msra.mxu1 %v1122_v39  ;;  %3174 = vmatprep.mubr.msk.bf16.mxu1 %vm3927_vm0, %v3310_v3  ;;  %v1366_v54 = vsel %vm399_vm1, %v1360_v52, 0 }
  0xb5   : > { %3178 = vmatprep.subr.bf16.mxu1 %v3310_v3 }
  0xb8   : > { %3048 = vmatmul.mubr.msk.bf16.vlgmr.msra.gmra.mxu0 %vm395_vm3, %v3046_v37 }
  0xb9   : > { %1139 = vmatpush1.bf16.msra.mxu0 %v1116_v41  ;;  %1156 = vmatprep.mubr.bf16.mxu0 %v3312_v6 }
  0xba   : > { %3055 = vmatprep.subr.msk.bf16.mxu0 %vm399_vm1, %v1236_v43 }
  0xbb   : > { %3175 = vmatmul.mubr.msk.bf16.vlgmr.msra.gmra.mxu1 %vm395_vm3, %v3050_v44 }
  0xbc   : > { %3179 = vmatpush3.bf16.msra.mxu1 %v1247_v45  ;;  %3180 = vmatprep.mubr.msk.bf16.mxu1 %vm3927_vm0, %v3310_v3 }
  0xbd   : > { %3184 = vmatprep.subr.bf16.mxu1 %v3310_v3 }
  0xc0   : > { %3052 = vmatmul.mubr.msk.bf16.vlgmr.msra.gmra.mxu0 %vm395_vm3, %v3050_v44 }
  0xc1   : > { %1264 = vmatpush1.bf16.msra.mxu0 %v1241_v49  ;;  %1281 = vmatprep.mubr.bf16.mxu0 %v3312_v6 }
  0xc2   : > { %3059 = vmatprep.subr.msk.bf16.mxu0 %vm399_vm1, %v1361_v50 }
  0xc3   : > { %3181 = vmatmul.mubr.msk.bf16.vlgmr.msra.gmra.mxu1 %vm395_vm3, %v3054_v51 }
  0xc4   : > { %3185 = vmatpush3.bf16.msra.mxu1 %v1372_v53  ;;  %3186 = vmatprep.mubr.msk.bf16.mxu1 %vm3927_vm0, %v3310_v3 }
  0xc5   : > { %3190 = vmatprep.subr.bf16.mxu1 %v3310_v3 }
  0xc8   : > { %3056 = vmatmul.mubr.msk.bf16.vlgmr.msra.gmra.mxu0 %vm395_vm3, %v3054_v51 }
  0xc9   : > { %1389 = vmatpush1.bf16.msra.mxu0 %v1366_v54  ;;  %1406 = vmatprep.mubr.bf16.mxu0 %v3312_v6 }
  0xcb   : > { %3187 = vmatmul.mubr.msk.bf16.vlgmr.msra.gmra.mxu1 %vm395_vm3, %v3058_v55 }
  0xcc   : > { %3192 = vmatprep.mubr.msk.bf16.mxu1 %vm3927_vm0, %v3310_v3 }
  0xd0   : > { %3060 = vmatmul.mubr.msk.bf16.vlgmr.msra.gmra.mxu0 %vm395_vm3, %v3058_v55 }
  0xd1   : > { %1865 = vmatprep.mubr.bf16.mxu0 %v3312_v6 }
 0x14b   : > { %v484_v56 = vpop.f32.mrf.mxu1 }
 0x14d   : > { %v3140_v57 = vpop.f32.mrf.mxu1 }
 0x14f   : > { %v487_v59 = vpop.f32.mrf.mxu1 }
 0x150   : > { %v443_v58 = vpop.f32.mrf.mxu0 }
 0x151   : > { %v3141_v61 = vpop.f32.mrf.mxu1 }
 0x152   : > { %v445_v60 = vpop.f32.mrf.mxu0 }
 0x153   : > { %v577_v63 = vpop.f32.mrf.mxu1 }
 0x154   : > { %v447_v62 = vpop.f32.mrf.mxu0  ;;  %v578_v46 = vadd.f32 %v577_v63, %v484_v56  ;;  %v3601_v56 = vld [vmem:[%s3909_s1] sm:$0x7] }
 0x155   : > { %v3146_v1 = vpop.f32.mrf.mxu1  ;;  %vm364_vm11 = vcmp.lt.s32.totalorder %v3601_v56, 16 }
 0x156   : > { %v448_v0 = vpop.f32.mrf.mxu0 }
 0x157   : > { %v580_v5 = vpop.f32.mrf.mxu1 }
 0x158   : > { %v536_v2 = vpop.f32.mrf.mxu0 }
 0x159   : > { %v3147_v9 = vpop.f32.mrf.mxu1  ;;  %v537_v51 = vadd.f32 %v536_v2, %v443_v58 }
 0x15a   : > { %v538_v8 = vpop.f32.mrf.mxu0 }
 0x15b   : > { %v699_v11 = vpop.f32.mrf.mxu1  ;;  %v539_v55 = vadd.f32 %v538_v8, %v445_v60  ;;  %v3605_v60 = vsub.s32 0, %v3393_v4 }
 0x15c   : > { %v540_v10 = vpop.f32.mrf.mxu0  ;;  %v707_v49 = vadd.f32 %v699_v11, %v578_v46 }
 0x15d   : > { %v3152_v13 = vpop.f32.mrf.mxu1 }
 0x15e   : > { %v541_v12 = vpop.f32.mrf.mxu0 }
 0x15f   : > { %v702_v15 = vpop.f32.mrf.mxu1 }
 0x160   : > { %v658_v14 = vpop.f32.mrf.mxu0 }
 0x161   : > { %v3153_v17 = vpop.f32.mrf.mxu1  ;;  %v705_v57 = vadd.f32 %v658_v14, %v537_v51 }
 0x162   : > { %v660_v16 = vpop.f32.mrf.mxu0  ;;  %v3608_v17 = vsub.s32 1, %v3393_v4 }
 0x163   : > { %v824_v19 = vpop.f32.mrf.mxu1  ;;  %v706_v0 = vadd.f32 %v660_v16, %v539_v55 }
 0x164   : > { %v662_v18 = vpop.f32.mrf.mxu0  ;;  %v832_v53 = vadd.f32 %v824_v19, %v707_v49 }
 0x165   : > { %v3158_v21 = vpop.f32.mrf.mxu1  ;;  %v3611_v18 = vsub.s32 2, %v3393_v4 }
 0x166   : > { %v663_v20 = vpop.f32.mrf.mxu0 }
 0x167   : > { %v827_v23 = vpop.f32.mrf.mxu1 }
 0x168   : > { %v783_v22 = vpop.f32.mrf.mxu0 }
 0x169   : > { %v3159_v25 = vpop.f32.mrf.mxu1  ;;  %v830_v1 = vadd.f32 %v783_v22, %v705_v57  ;;  %v1467_v22 = vsel %vm364_vm11, 1, %v3312_v6  ;;  %vm3923_vm11 = vcmask 240640  }
 0x16a   : > { %v785_v24 = vpop.f32.mrf.mxu0  ;;  %v1462_v25 = vpop.permute.xlu0 %1461 }
 0x16b   : > { %v949_v27 = vpop.f32.mrf.mxu1  ;;  %v831_v10 = vadd.f32 %v785_v24, %v706_v0 }
 0x16c   : > { %v787_v26 = vpop.f32.mrf.mxu0  ;;  %v957_v61 = vadd.f32 %v949_v27, %v832_v53 }
 0x16d   : > { %v3164_v29 = vpop.f32.mrf.mxu1  ;;  %v1471_v26 = vrot.slane %v1467_v22, %v3605_v60 }
 0x16e   : > { %v788_v28 = vpop.f32.mrf.mxu0 }
 0x16f   : > { %v952_v31 = vpop.f32.mrf.mxu1  ;;  %vm3617_vm12 = vcmp.eq.s32.totalorder %v1471_v26, 1 }
 0x170   : > { %v908_v30 = vpop.f32.mrf.mxu0  ;;  %v1475_v31 = vrot.slane %v1467_v22, %v3608_v17 }
 0x171   : > { %v3165_v33 = vpop.f32.mrf.mxu1  ;;  %v955_v58 = vadd.f32 %v908_v30, %v830_v1 }
 0x172   : > { %v910_v32 = vpop.f32.mrf.mxu0  ;;  %vm3621_vm13 = vcmp.eq.s32.totalorder %v1475_v31, 1 }
 0x173   : > { %v1074_v35 = vpop.f32.mrf.mxu1  ;;  %v956_v8 = vadd.f32 %v910_v32, %v831_v10  ;;  %v1479_v32 = vrot.slane %v1467_v22, %v3611_v18 }
 0x174   : > { %v912_v34 = vpop.f32.mrf.mxu0  ;;  %v1082_v63 = vadd.f32 %v1074_v35, %v957_v61 }
 0x175   : > { %v3170_v37 = vpop.f32.mrf.mxu1  ;;  %vm3625_vm14 = vcmp.eq.s32.totalorder %v1479_v32, 1 }
 0x176   : > { %v913_v36 = vpop.f32.mrf.mxu0 }
 0x177   : > { %v1077_v39 = vpop.f32.mrf.mxu1 }
 0x178   : > { %v1033_v38 = vpop.f32.mrf.mxu0 }
 0x179   : > { %v3171_v41 = vpop.f32.mrf.mxu1  ;;  %v1080_v13 = vadd.f32 %v1033_v38, %v955_v58  ;;  %v1521_v58 = vld [vmem:[%s3912_s4] sm:$0xf] }
 0x17a   : > { %v1035_v40 = vpop.f32.mrf.mxu0 }
 0x17b   : > { %v1199_v43 = vpop.f32.mrf.mxu1  ;;  %v1081_v19 = vadd.f32 %v1035_v40, %v956_v8 }
 0x17c   : > { %v1037_v42 = vpop.f32.mrf.mxu0  ;;  %v1207_v11 = vadd.f32 %v1199_v43, %v1082_v63  ;;  %v2929_v43 = vld [vmem:[%s3917_s9] sm:$0xf] }
 0x17d   : > { %v3176_v45 = vpop.f32.mrf.mxu1 }
 0x17e   : > { %v1038_v44 = vpop.f32.mrf.mxu0 }
 0x17f   : > { %v1202_v48 = vpop.f32.mrf.mxu1 }
 0x180   : > { %v1158_v47 = vpop.f32.mrf.mxu0 }
 0x181   : > { %v3177_v52 = vpop.f32.mrf.mxu1  ;;  %v1205_v20 = vadd.f32 %v1158_v47, %v1080_v13 }
 0x182   : > { %v1160_v50 = vpop.f32.mrf.mxu0 }
 0x183   : > { %v1324_v59 = vpop.f32.mrf.mxu1  ;;  %v1206_v27 = vadd.f32 %v1160_v50, %v1081_v19 }
 0x184   : > { %v1162_v54 = vpop.f32.mrf.mxu0  ;;  %v1332_v15 = vadd.f32 %v1324_v59, %v1207_v11 }
 0x185   : > { %v3182_v5 = vpop.f32.mrf.mxu1 }
 0x186   : > { %v1163_v62 = vpop.f32.mrf.mxu0 }
 0x187   : > { %v1327_v2 = vpop.f32.mrf.mxu1 }
 0x188   : > { %v1283_v9 = vpop.f32.mrf.mxu0  ;;  %v1530_v2 = vld [vmem:[%s3913_s5] sm:$0xf] }
 0x189   : > { %v3183_v14 = vpop.f32.mrf.mxu1  ;;  %v1330_v28 = vadd.f32 %v1283_v9, %v1205_v20 }
 0x18a   : > { %v1285_v12 = vpop.f32.mrf.mxu0 }
 0x18b   : > { %v1449_v21 = vpop.f32.mrf.mxu1  ;;  %v1331_v33 = vadd.f32 %v1285_v12, %v1206_v27 }
 0x18c   : > { %v1287_v16 = vpop.f32.mrf.mxu0  ;;  %v1457_v23 = vadd.f32 %v1449_v21, %v1332_v15 }
 0x18d   : > { %v3188_v29 = vpop.f32.mrf.mxu1 }
 0x18e   : > { %v1288_v24 = vpop.f32.mrf.mxu0  ;;  %v1466_v34 = vadd.f32 %v1462_v25, %v1457_v23 }
 0x18f   : > { %v1452_v36 = vpop.f32.mrf.mxu1 }
 0x190   : > { %v1408_v30 = vpop.f32.mrf.mxu0  ;;  %v1497_v48 = vmul.f32 %v1466_v34, %v1466_v34  ;;  %v1485_v52 = vsel %vm3625_vm14, %v1466_v34, 0.0 }
 0x191   : > { %v1455_v35 = vadd.f32 %v1408_v30, %v1330_v28  ;;  %v3189_v41 = vpop.f32.mrf.mxu1  ;;  %v1491_v62 = vsel %vm3923_vm11, %v1485_v52, 0.0 }
 0x192   : > { %v1410_v37 = vpop.f32.mrf.mxu0  ;;  %v1500_v61 = vsel %vm3625_vm14, %v1497_v48, 0.0 }
 0x193   : > { %v1464_v39 = vadd.f32 %v1462_v25, %v1455_v35  ;;  %v1456_v40 = vadd.f32 %v1410_v37, %v1331_v33  ;;  %v1504_v9 = vsel %vm3923_vm11, %v1500_v61, 0.0  ;;  %vm1572_vm11 = vcmask 154624  }
 0x194   : > { %v1412_v42 = vpop.f32.mrf.mxu0  ;;  %v1608_v61 = vsub.s32 4, %v3393_v4 }
 0x195   : > { %v1495_v45 = vmul.f32 %v1464_v39, %v1464_v39  ;;  %v1465_v46 = vadd.f32 %v1462_v25, %v1456_v40  ;;  %v1483_v47 = vsel %vm3617_vm12, %v1464_v39, 0.0 }
 0x196   : > { %v1413_v49 = vpop.f32.mrf.mxu0  ;;  %v1487_v54 = vsel %vm3921_vm15, %v1483_v47, 0.0 }
 0x197   : > { %v1496_v50 = vmul.f32 %v1465_v46, %v1465_v46  ;;  %v1484_v51 = vsel %vm3621_vm13, %v1465_v46, 0.0  ;;  %v1498_v53 = vsel %vm3617_vm12, %v1495_v45, 0.0 }
 0x198   : > { %v1488_v55 = vsel %vm3921_vm15, %v1484_v51, 0.0  ;;  %v1501_v0 = vsel %vm3921_vm15, %v1498_v53, 0.0 }
 0x199   : > { %v1489_v57 = vadd.f32 %v1488_v55, %v1487_v54  ;;  %v1499_v59 = vsel %vm3621_vm13, %v1496_v50, 0.0 }
 0x19a   : > { %v1502_v1 = vsel %vm3921_vm15, %v1499_v59, 0.0  ;;  %vm1546_vm15 = vmor %vm1545_vm10, %vm399_vm1 }
 0x19b   : > { %v1492_v5 = vadd.f32 %v1491_v62, %v1489_v57  ;;  %v1503_v63 = vadd.f32 %v1502_v1, %v1501_v0  ;;  %vm1548_vm8 = vmor %vm1547_vm9, %vm1546_vm15  ;;  %vm1577_vm15 = vcmask 398340  }
 0x19c   : > { %1549 = vst.msk [vmem:[#allocation2] sm:$0x3f] %vm1548_vm8, %v3312_v6  ;;  %vm1575_vm8 = vcmask 1041560  }
 0x19d   : > { %1493 = vadd.xlane.f32.xlu1 %v1492_v5  ;;  %v1505_v10 = vadd.f32 %v1504_v9, %v1503_v63  ;;  %vm1576_vm9 = vmor %vm1545_vm10, %vm1575_vm8  ;;  %vm1581_vm8 = vcmp.eq.s32.totalorder %v3601_v56, 1 }
 0x19e   : > { %vm1578_vm7 = vmor %vm1577_vm15, %vm1576_vm9  ;;  %v1582_v54 = vsel %vm1581_vm8, 1, %v3312_v6  ;;  %vm1640_vm8 = vcmask 908288  }
 0x19f   : > { %1506 = vadd.xlane.f32.xlu0 %v1505_v10  ;;  %v1586_v55 = vrot.slane %v1582_v54, %v3605_v60  ;;  %v1590_v57 = vrot.slane %v1582_v54, %v3608_v17  ;;  %v1594_v59 = vrot.slane %v1582_v54, %v3611_v18 }
 0x1a1   : > { %vm1597_vm9 = vcmp.eq.s32.totalorder %v1594_v59, 1 }
 0x1a2   : > { %vm1599_vm6 = vmpackc.low %vm1597_vm9, %vm1597_vm9  ;;  %vm1671_vm9 = vcmask 138240  }
 0x1a3   : > { %v1601_v0 = vsel %vm1599_vm6, 65537, %v3312_v6  ;;  %vm1674_vm6 = vcmask 1041544  }
 0x1a4   : > { %v1613_v63 = vrot.slane %v1601_v0, %v3605_v60 }
 0x1a6   : > { %vm1616_vm4 = vcmp.ne.s16.totalorder %v1613_v63, 0 }
 0x1ae   : > { %1524 = vperm.xlu1 %3273, %v1521_v58  }
 0x1b5   : > { %1533 = vperm.xlu0 %3272, %v1530_v2  }
 0x226   : > { %v1494_v11 = vpop.xlane.xlu1 %1493 }
 0x227   : > { %v1508_v12 = vmul.f32 0.00390625, %v1494_v11 }
 0x228   : > { %v1507_v8 = vpop.xlane.xlu0 %1506 }
 0x229   : > { %v1509_v13 = vmul.f32 0.00390625, %v1507_v8  ;;  %v1510_v14 = vmul.f32 %v1508_v12, %v1508_v12  ;;  %v1513_v20 = vsub.f32 %v1464_v39, %v1508_v12  ;;  %v1514_v21 = vsub.f32 %v1465_v46, %v1508_v12 }
 0x22a   : > { %v1515_v22 = vsub.f32 %v1466_v34, %v1508_v12  ;;  %v1525_v24 = vpop.permute.xlu1 %1524 }
 0x22b   : > { %v1511_v15 = vsub.f32 %v1509_v13, %v1510_v14 }
 0x22d   : > { %v1512_v16 = vmax.f32 %v1511_v15, 0.0 }
 0x22f   : > { %v1516_v19 = vadd.f32 1e-05, %v1512_v16 }
 0x230   : > { %v1534_v31 = vpop.permute.xlu0 %1533 }
 0x231   : > { %3297 = vrsqrt.f32 %v1516_v19 }
 0x23e   : > { %v3298_v23 = vpop.eup %3297 }
 0x23f   : > { %v1518_v25 = vmul.f32 %v3298_v23, %v1513_v20  ;;  %v1519_v26 = vmul.f32 %v3298_v23, %v1514_v21  ;;  %v1520_v27 = vmul.f32 %v3298_v23, %v1515_v22 }
 0x241   : > { %v1527_v28 = vmul.f32 %v1525_v24, %v1518_v25  ;;  %v1528_v29 = vmul.f32 %v1525_v24, %v1519_v26  ;;  %v1529_v30 = vmul.f32 %v1525_v24, %v1520_v27 }
 0x243   : > { %v1536_v32 = vadd.f32 %v1534_v31, %v1527_v28  ;;  %v1537_v33 = vadd.f32 %v1534_v31, %v1528_v29  ;;  %v1538_v35 = vadd.f32 %v1534_v31, %v1529_v30 }
 0x245   : > { %v1539_v36 = vmax.f32 %v1536_v32, 0.0  ;;  %v1540_v37 = vmax.f32 %v1537_v33, 0.0  ;;  %v1541_v40 = vmax.f32 %v1538_v35, 0.0 }
 0x247   : > { %v3656_v41 = vpack.c.bf16 %v1541_v40, %v1541_v40  ;;  %v3062_v39 = vpack.c.bf16 %v1540_v37, %v1539_v36  ;;  %v1542_v2 = vpack.c.bf16 %v1539_v36, %v1539_v36  ;;  %v1543_v11 = vpack.c.bf16 %v1540_v37, %v1540_v37 }
 0x249   : > { %v1560_v34 = vrot.slane %v3062_v39, %v3401_v7  ;;  %v1567_v42 = vrot.slane %v3656_v41, %v3401_v7 }
 0x24b   : > { %v1568_v45 = vcombine.low %v1560_v34, %v1567_v42 }
 0x24d   : > { %1569 = vrot.lane.b32.xlu1 %v1568_v45, %s3321_s17 }
 0x2bf   : > { %v1570_v46 = vpop.permute.xlu1 %1569 }
 0x2c0   : > { %v1571_v47 = vrot.slane %v1570_v46, 6 }
 0x2c2   : > { %v1573_v48 = vsel %vm1572_vm11, %v1571_v47, %v1570_v46  ;;  %vm1596_vm11 = vcmp.eq.s32.totalorder %v1590_v57, 1 }
 0x2c3   : > { %1579 = vst.msk [vmem:[#allocation2] sm:$0x3f] %vm1578_vm7, %v1573_v48  ;;  %vm1595_vm7 = vcmp.eq.s32.totalorder %v1586_v55, 1 }
 0x2c4   : > { %vm1598_vm15 = vmpackc.low %vm1596_vm11, %vm1595_vm7  ;;  %vm1676_vm11 = vcmask 381956  }
 0x2c5   : > { %v1600_v62 = vsel %vm1598_vm15, 65537, %v3312_v6  ;;  %vm1675_vm7 = vmor %vm1545_vm10, %vm1674_vm6 }
 0x2c6   : > { %v1605_v1 = vrot.slane %v1600_v62, %v3605_v60  ;;  %v1609_v5 = vrot.slane %v1600_v62, %v1608_v61  ;;  %vm1677_vm15 = vmor %vm1676_vm11, %vm1675_vm7  ;;  %vm1739_vm11 = vcmask 875520  }
 0x2c8   : > { %vm1614_vm5 = vcmp.ne.s16.totalorder %v1605_v1, 0  ;;  %vm1615_vm0 = vcmp.ne.s16.totalorder %v1609_v5, 0 }
 0x2ca   : > { %v1580_v49 = vld [vmem:[#allocation2] sm:$0x3f] }
 0x2cb   : > { %v1625_v50 = vrot.slane %v1580_v49, %v3401_v7  ;;  %v1618_v51 = vcombine.high %v1580_v49, %v1580_v49 }
 0x2cd   : > { %1634 = vrot.lane.b32.xlu1 %v1625_v50, %s3322_s27  ;;  %v1633_v52 = vcombine.high %v1625_v50, %v1625_v50  ;;  %v1632_v53 = vrot.slane %v1618_v51, %v3401_v7 }
 0x2cf   : > { %1636 = vrot.lane.b32.xlu0 %v1633_v52, %s3322_s27 }
 0x2d1   : > { %1638 = vrot.lane.b32.xlu1 %v1632_v53, %s3322_s27 }
 0x33f   : > { %v1635_v9 = vpop.permute.xlu1 %1634 }
 0x341   : > { %v1637_v10 = vpop.permute.xlu0 %1636 }
 0x342   : > { %v1641_v58 = vsel %vm1640_vm8, %v1635_v9, %v1637_v10 }
 0x343   : > { %v1639_v12 = vpop.permute.xlu1 %1638  ;;  %v1646_v8 = vsel %vm1614_vm5, %v1542_v2, %v1641_v58 }
 0x344   : > { %v1642_v4 = vsel %vm1640_vm8, %v1637_v10, %v1639_v12  ;;  %v1648_v14 = vsel %vm1616_vm4, %v3656_v41, %v1639_v12 }
 0x345   : > { %v1647_v13 = vsel %vm1615_vm0, %v1543_v11, %v1642_v4  ;;  %v1666_v16 = vrot.slane %v1648_v14, %v3401_v7  ;;  %vm1680_vm0 = vcmp.eq.s32.totalorder %v3601_v56, 14 }
 0x346   : > { %v1652_v15 = vcombine.low %v1646_v8, %v1647_v13  ;;  %v1681_v29 = vsel %vm1680_vm0, 1, %v3312_v6 }
 0x347   : > { %v1685_v30 = vrot.slane %v1681_v29, %v3605_v60  ;;  %v1689_v31 = vrot.slane %v1681_v29, %v3608_v17  ;;  %v1693_v32 = vrot.slane %v1681_v29, %v3611_v18 }
 0x348   : > { %v1659_v19 = vrot.slane %v1652_v15, %v3401_v7 }
 0x349   : > { %vm1694_vm4 = vcmp.eq.s32.totalorder %v1685_v30, 1  ;;  %vm1695_vm5 = vcmp.eq.s32.totalorder %v1689_v31, 1  ;;  %vm1696_vm8 = vcmp.eq.s32.totalorder %v1693_v32, 1 }
 0x34a   : > { %v1667_v20 = vcombine.low %v1659_v19, %v1666_v16  ;;  %vm1697_vm6 = vmpackc.low %vm1695_vm5, %vm1694_vm4  ;;  %vm1773_vm4 = vcmask 1041576  }
 0x34b   : > { %vm1698_vm7 = vmpackc.low %vm1696_vm8, %vm1696_vm8  ;;  %v1699_v33 = vsel %vm1697_vm6, 65537, %v3312_v6  ;;  %vm1775_vm8 = vcmask 414724   ;;  %vm1770_vm6 = vcmask 171008  }
 0x34c   : > { %1668 = vrot.lane.b32.xlu0 %v1667_v20, %s3323_s28  ;;  %v1700_v35 = vsel %vm1698_vm7, 65537, %v3312_v6  ;;  %v1704_v36 = vrot.slane %v1699_v33, %v3605_v60  ;;  %v1708_v56 = vrot.slane %v1699_v33, %v1608_v61  ;;  %vm1774_vm5 = vmor %vm1545_vm10, %vm1773_vm4  ;;  %vm3937_vm10 = vmmov 0  }
 0x34d   : > { %v1712_v37 = vrot.slane %v1700_v35, %v3605_v60  ;;  %vm1776_vm7 = vmor %vm1775_vm8, %vm1774_vm5  ;;  %vm3941_vm5 = vcmask 891904  }
 0x34e   : > { %vm3942_vm8 = vmmov %vm3941_vm5 }
 0x34f   : > { %vm1715_vm0 = vcmp.ne.s16.totalorder %v1712_v37, 0 }
 0x3be   : > { %v1669_v21 = vpop.permute.xlu0 %1668 }
 0x3bf   : > { %v1670_v22 = vrot.slane %v1669_v21, 6 }
 0x3c1   : > { %v1672_v23 = vsel %vm1671_vm9, %v1670_v22, %v1669_v21  ;;  %vm1713_vm9 = vcmp.ne.s16.totalorder %v1704_v36, 0 }
 0x3c2   : > { %1678 = vst.msk [vmem:[#allocation2] sm:$0x3f] %vm1677_vm15, %v1672_v23  ;;  %vm1714_vm15 = vcmp.ne.s16.totalorder %v1708_v56, 0 }
 0x3c9   : > { %v1679_v24 = vld [vmem:[#allocation2] sm:$0x3f] }
 0x3ca   : > { %v1724_v25 = vrot.slane %v1679_v24, %v3401_v7  ;;  %v1717_v26 = vcombine.high %v1679_v24, %v1679_v24 }
 0x3cc   : > { %1733 = vrot.lane.b32.xlu1 %v1724_v25, %s3324_s29  ;;  %v1732_v27 = vcombine.high %v1724_v25, %v1724_v25  ;;  %v1731_v28 = vrot.slane %v1717_v26, %v3401_v7 }
 0x3ce   : > { %1735 = vrot.lane.b32.xlu0 %v1732_v27, %s3324_s29 }
 0x3d0   : > { %1737 = vrot.lane.b32.xlu1 %v1731_v28, %s3324_s29 }
 0x43e   : > { %v1734_v40 = vpop.permute.xlu1 %1733 }
 0x440   : > { %v1736_v39 = vpop.permute.xlu0 %1735 }
 0x441   : > { %v1740_v17 = vsel %vm1739_vm11, %v1734_v40, %v1736_v39 }
 0x442   : > { %v1738_v18 = vpop.permute.xlu1 %1737  ;;  %v1745_v42 = vsel %vm1713_vm9, %v1542_v2, %v1740_v17  ;;  %vm1783_vm9 = vcmask 140288  }
 0x443   : > { %v1741_v34 = vsel %vm1739_vm11, %v1736_v39, %v1738_v18  ;;  %v1747_v46 = vsel %vm1715_vm0, %v3656_v41, %v1738_v18  ;;  %vm1790_vm11 = vcmask 550288   ;;  %v2875_v39 = vld [vmem:[%s3915_s7] sm:$0xf]  ;;  %vm3939_vm0 = vcmask 900096  }
 0x444   : > { %v1746_v45 = vsel %vm1714_vm15, %v1543_v11, %v1741_v34  ;;  %v1765_v48 = vrot.slane %v1747_v46, %v3401_v7  ;;  %vm3940_vm4 = vmmov %vm3939_vm0 }
 0x445   : > { %v1751_v47 = vcombine.low %v1745_v42, %v1746_v45 }
 0x447   : > { %v1758_v49 = vrot.slane %v1751_v47, %v3401_v7 }
 0x449   : > { %v1766_v50 = vcombine.low %v1758_v49, %v1765_v48 }
 0x44b   : > { %1767 = vrot.lane.b32.xlu0 %v1766_v50, %s3325_s30 }
 0x4bd   : > { %v1768_v60 = vpop.permute.xlu0 %1767 }
 0x4be   : > { %v1769_v51 = vrot.slane %v1768_v60, 6 }
 0x4c0   : > { %v1771_v52 = vsel %vm1770_vm6, %v1769_v51, %v1768_v60  ;;  %vm3943_vm6 = vcmask 883712  }
 0x4c1   : > { %1777 = vst.msk [vmem:[#allocation2] sm:$0x3f] %vm1776_vm7, %v1771_v52  ;;  %vm3944_vm7 = vmmov %vm3943_vm6 }
 0x4c8   : > { %v1785_v53 = vld [vmem:[#allocation2 + $0x4] sm:$0x3]  ;;  %v1778_v41 = vld [vmem:[#allocation2] sm:$0x3] }
 0x4c9   : > { %1787 = vrot.lane.b32.xlu0 %v1785_v53, %s3326_s11  ;;  %1780 = vrot.lane.b32.xlu1 %v1778_v41, %s3318_s24 }
 0x53b   : > { %v1788_v54 = vpop.permute.xlu0 %1787  ;;  %v1781_v55 = vpop.permute.xlu1 %1780 }
 0x53c   : > { %1791 = vst.msk [vmem:[#allocation2 + $0x4] sm:$0x3] %vm1790_vm11, %v1788_v54  ;;  %v1792_v54 = vld [vmem:[%s3914_s6] sm:$0x3]  ;;  %vm3945_vm11 = vcmask 752640  }
 0x53d   : > { %1784 = vst.msk [vmem:[#allocation2] sm:$0x3] %vm1783_vm9, %v1781_v55  ;;  %vm3946_vm9 = vmmov %vm3945_vm11 }
 0x544   : > { %v1793_v57 = vld [vmem:[#allocation2] sm:$0x3f] }
 0x545   : > { %v3695_v59 = vrot.slane %v1793_v57, %v3401_v7  ;;  %v1797_v61 = vcombine.high %v1793_v57, %v1793_v57  ;;  %v2009_v62 = vld [vmem:[#allocation2] sm:$0x3f] }
 0x546   : > { %v2018_v5 = vrot.slane %v2009_v62, %v3401_v7  ;;  %v2011_v63 = vcombine.high %v2009_v62, %v2009_v62  ;;  %v2133_v9 = vld [vmem:[#allocation2] sm:$0x3f] }
 0x547   : > { %1813 = vrot.lane.b32.xlu1 %v3695_v59, %s3313_s19  ;;  %v3701_v0 = vcombine.high %v3695_v59, %v3695_v59  ;;  %v3706_v1 = vrot.slane %v1797_v61, %v3401_v7  ;;  %v2142_v2 = vrot.slane %v2133_v9, %v3401_v7  ;;  %v2135_v11 = vcombine.high %v2133_v9, %v2133_v9  ;;  %v2257_v12 = vld [vmem:[#allocation2] sm:$0x3f] }
 0x548   : > { %v2026_v10 = vcombine.high %v2018_v5, %v2018_v5  ;;  %v2025_v58 = vrot.slane %v2011_v63, %v3401_v7  ;;  %v2266_v13 = vrot.slane %v2257_v12, %v3401_v7  ;;  %v2259_v14 = vcombine.high %v2257_v12, %v2257_v12  ;;  %v2381_v15 = vld [vmem:[#allocation2] sm:$0x3f] }
 0x549   : > { %1815 = vrot.lane.b32.xlu0 %v3701_v0, %s3313_s19  ;;  %v2150_v4 = vcombine.high %v2142_v2, %v2142_v2  ;;  %v2149_v8 = vrot.slane %v2135_v11, %v3401_v7  ;;  %v2390_v20 = vrot.slane %v2381_v15, %v3401_v7  ;;  %v2383_v21 = vcombine.high %v2381_v15, %v2381_v15  ;;  %v2505_v22 = vld [vmem:[#allocation2] sm:$0x3f] }
 0x54a   : > { %v2274_v16 = vcombine.high %v2266_v13, %v2266_v13  ;;  %v2273_v19 = vrot.slane %v2259_v14, %v3401_v7  ;;  %v2514_v25 = vrot.slane %v2505_v22, %v3401_v7  ;;  %v2507_v26 = vcombine.high %v2505_v22, %v2505_v22  ;;  %v2629_v27 = vld [vmem:[#allocation2] sm:$0x3f]  ;;  %v3078_v22 = vld [vmem:[%s3914_s6 + $0x8] sm:$0x3] }
 0x54b   : > { %1817 = vrot.lane.b32.xlu1 %v3706_v1, %s3313_s19  ;;  %v2398_v23 = vcombine.high %v2390_v20, %v2390_v20  ;;  %v2397_v24 = vrot.slane %v2383_v21, %v3401_v7  ;;  %v2638_v30 = vrot.slane %v2629_v27, %v3401_v7  ;;  %v2631_v31 = vcombine.high %v2629_v27, %v2629_v27  ;;  %v2753_v32 = vld [vmem:[#allocation2] sm:$0x3f] }
 0x54c   : > { %v2522_v28 = vcombine.high %v2514_v25, %v2514_v25  ;;  %v2521_v29 = vrot.slane %v2507_v26, %v3401_v7  ;;  %v2762_v36 = vrot.slane %v2753_v32, %v3401_v7  ;;  %v2755_v56 = vcombine.high %v2753_v32, %v2753_v32  ;;  %v3070_v63 = vld [vmem:[%s3914_s6 + $0x4] sm:$0x3] }
 0x54d   : > { %2027 = vrot.lane.b32.xlu0 %v2018_v5, %s3314_s20  ;;  %v2646_v33 = vcombine.high %v2638_v30, %v2638_v30  ;;  %v2645_v35 = vrot.slane %v2631_v31, %v3401_v7  ;;  %v1924_v50 = vsel %vm399_vm1, %v3706_v1, 0  ;;  %v1918_v51 = vsel %vm399_vm1, %v3695_v59, 0 }
 0x54e   : > { %v2770_v37 = vcombine.high %v2762_v36, %v2762_v36  ;;  %v2769_v40 = vrot.slane %v2755_v56, %v3401_v7  ;;  %v3063_v7 = vld [vmem:[%s3914_s6 + $0x2] sm:$0x3]  ;;  %v3086_v56 = vld [vmem:[%s3914_s6 + $0xc] sm:$0x3] }
 0x54f   : > { %2029 = vrot.lane.b32.xlu1 %v2026_v10, %s3314_s20 }
 0x551   : > { %2031 = vrot.lane.b32.xlu0 %v2025_v58, %s3314_s20 }
 0x553   : > { %2151 = vrot.lane.b32.xlu1 %v2142_v2, %s3315_s21 }
 0x555   : > { %2153 = vrot.lane.b32.xlu0 %v2150_v4, %s3315_s21 }
 0x557   : > { %2155 = vrot.lane.b32.xlu1 %v2149_v8, %s3315_s21  ;;  %v3074_v8 = vld [vmem:[%s3914_s6 + $0x6] sm:$0x3] }
 0x559   : > { %2275 = vrot.lane.b32.xlu0 %v2266_v13, %s3316_s22 }
 0x55b   : > { %2277 = vrot.lane.b32.xlu1 %v2274_v16, %s3316_s22 }
 0x55d   : > { %2279 = vrot.lane.b32.xlu0 %v2273_v19, %s3316_s22 }
 0x55f   : > { %2399 = vrot.lane.b32.xlu1 %v2390_v20, %s3317_s23 }
 0x561   : > { %2401 = vrot.lane.b32.xlu0 %v2398_v23, %s3317_s23 }
 0x563   : > { %2403 = vrot.lane.b32.xlu1 %v2397_v24, %s3317_s23 }
 0x565   : > { %2523 = vrot.lane.b32.xlu0 %v2514_v25, %s3318_s24 }
 0x567   : > { %2525 = vrot.lane.b32.xlu1 %v2522_v28, %s3318_s24 }
 0x569   : > { %2527 = vrot.lane.b32.xlu0 %v2521_v29, %s3318_s24  ;;  %v3082_v29 = vld [vmem:[%s3914_s6 + $0xa] sm:$0x3] }
 0x56b   : > { %2647 = vrot.lane.b32.xlu1 %v2638_v30, %s3319_s25 }
 0x56d   : > { %2649 = vrot.lane.b32.xlu0 %v2646_v33, %s3319_s25 }
 0x56f   : > { %2651 = vrot.lane.b32.xlu1 %v2645_v35, %s3319_s25 }
 0x571   : > { %2771 = vrot.lane.b32.xlu0 %v2762_v36, %s3320_s26 }
 0x573   : > { %2773 = vrot.lane.b32.xlu1 %v2770_v37, %s3320_s26 }
 0x575   : > { %2775 = vrot.lane.b32.xlu0 %v2769_v40, %s3320_s26 }
 0x577   : > { %2878 = vperm.xlu1 %3273, %v2875_v39  }
 0x5b9   : > { %v1814_v17 = vpop.permute.xlu1 %1813 }
 0x5bb   : > { %v1816_v18 = vpop.permute.xlu0 %1815 }
 0x5bc   : > { %v1819_v34 = vsel %vm392_vm2, %v1814_v17, %v1816_v18 }
 0x5bd   : > { %v1818_v42 = vpop.permute.xlu1 %1817  ;;  %v1825_v47 = vsel %vm399_vm1, %v1819_v34, 0 }
 0x5be   : > { %v1820_v45 = vsel %vm392_vm2, %v1816_v18, %v1818_v42  ;;  %v1831_v46 = vsel %vm399_vm1, %v1818_v42, 0  ;;  %vm3936_vm2 = vcmask 1031168   ;;  %v3090_v42 = vld [vmem:[%s3914_s6 + $0xe] sm:$0x3] }
 0x5bf   : > { %v2028_v48 = vpop.permute.xlu0 %2027  ;;  %3064 = vmatprep.subr.msk.bf16.mxu0 %vm399_vm1, %v1820_v45  ;;  %3191 = vmatpush3.bf16.msra.mxu1 %v1831_v46  ;;  %vm3938_vm15 = vmmov %vm3936_vm2 }
 0x5c0   : > { %1848 = vmatpush1.bf16.msra.mxu0 %v1825_v47  ;;  %3196 = vmatprep.subr.bf16.mxu1 %v3310_v3 }
 0x5c1   : > { %3067 = vmatprep.subr.msk.bf16.mxu0 %vm399_vm1, %v3701_v0  ;;  %v2030_v49 = vpop.permute.xlu1 %2029 }
 0x5c2   : > { %3193 = vmatmul.mubr.msk.bf16.vlgmr.msra.gmra.mxu1 %vm395_vm3, %v3063_v7  ;;  %v2033_v55 = vsel %vm3938_vm15, %v2028_v48, %v2030_v49  ;;  %v3094_v48 = vld [vmem:[%s3914_s6 + $0x10] sm:$0x3] }
 0x5c3   : > { %v2032_v60 = vpop.permute.xlu0 %2031  ;;  %3065 = vmatmul.mubr.msk.bf16.vlgmr.msra.gmra.mxu0 %vm395_vm3, %v3063_v7  ;;  %3197 = vmatpush3.bf16.msra.mxu1 %v1924_v50  ;;  %v2039_v62 = vsel %vm399_vm1, %v2033_v55, 0 }
 0x5c4   : > { %v2034_v52 = vsel %vm3936_vm2, %v2030_v49, %v2032_v60  ;;  %1941 = vmatpush1.bf16.msra.mxu0 %v1918_v51  ;;  %3198 = vmatprep.mubr.msk.bf16.mxu1 %vm3937_vm10, %v3310_v3  ;;  %v2045_v59 = vsel %vm399_vm1, %v2032_v60, 0  ;;  %vm3947_vm2 = vcmask 744448  }
 0x5c5   : > { %3071 = vmatprep.subr.msk.bf16.mxu0 %vm399_vm1, %v2034_v52  ;;  %v2152_v53 = vpop.permute.xlu1 %2151  ;;  %3202 = vmatprep.subr.bf16.mxu1 %v3310_v3  ;;  %vm3948_vm15 = vmmov %vm3947_vm2 }
 0x5c6   : > { %1958 = vmatprep.mubr.bf16.mxu0 %v3312_v6 }
 0x5c7   : > { %v2154_v41 = vpop.permute.xlu0 %2153 }
 0x5c8   : > { %v2157_v9 = vsel %vm3940_vm4, %v2152_v53, %v2154_v41 }
 0x5c9   : > { %v2156_v57 = vpop.permute.xlu1 %2155  ;;  %v2163_v2 = vsel %vm399_vm1, %v2157_v9, 0 }
 0x5ca   : > { %v2158_v61 = vsel %vm3939_vm0, %v2154_v41, %v2156_v57  ;;  %3199 = vmatmul.mubr.msk.bf16.vlgmr.msra.gmra.mxu1 %vm395_vm3, %v1792_v54  ;;  %v2169_v58 = vsel %vm399_vm1, %v2156_v57, 0  ;;  %vm3949_vm0 = vcmask 736256  }
 0x5cb   : > { %3203 = vmatpush3.bf16.msra.mxu1 %v2045_v59  ;;  %v2276_v0 = vpop.permute.xlu0 %2275  ;;  %3068 = vmatmul.mubr.msk.bf16.vlgmr.msra.gmra.mxu0 %vm395_vm3, %v1792_v54  ;;  %vm3950_vm4 = vmmov %vm3949_vm0 }
 0x5cc   : > { %2062 = vmatpush1.bf16.msra.mxu0 %v2039_v62  ;;  %3204 = vmatprep.mubr.msk.bf16.mxu1 %vm3937_vm10, %v3310_v3 }
 0x5cd   : > { %3075 = vmatprep.subr.msk.bf16.mxu0 %vm399_vm1, %v2158_v61  ;;  %v2278_v1 = vpop.permute.xlu1 %2277  ;;  %3208 = vmatprep.subr.bf16.mxu1 %v3310_v3 }
 0x5ce   : > { %2079 = vmatprep.mubr.bf16.mxu0 %v3312_v6  ;;  %v2281_v13 = vsel %vm3942_vm8, %v2276_v0, %v2278_v1 }
 0x5cf   : > { %v2280_v5 = vpop.permute.xlu0 %2279  ;;  %v2287_v16 = vsel %vm399_vm1, %v2281_v13, 0 }
 0x5d0   : > { %v2282_v12 = vsel %vm3941_vm5, %v2278_v1, %v2280_v5  ;;  %v2293_v15 = vsel %vm399_vm1, %v2280_v5, 0 }
 0x5d1   : > { %v2400_v10 = vpop.permute.xlu1 %2399 }
 0x5d2   : > { %3205 = vmatmul.mubr.msk.bf16.vlgmr.msra.gmra.mxu1 %vm395_vm3, %v3070_v63 }
 0x5d3   : > { %3209 = vmatpush3.bf16.msra.mxu1 %v2169_v58  ;;  %v2402_v11 = vpop.permute.xlu0 %2401  ;;  %3072 = vmatmul.mubr.msk.bf16.vlgmr.msra.gmra.mxu0 %vm395_vm3, %v3070_v63 }
 0x5d4   : > { %2186 = vmatpush1.bf16.msra.mxu0 %v2163_v2  ;;  %3210 = vmatprep.mubr.msk.bf16.mxu1 %vm3937_vm10, %v3310_v3  ;;  %v2405_v23 = vsel %vm3944_vm7, %v2400_v10, %v2402_v11 }
 0x5d5   : > { %3079 = vmatprep.subr.msk.bf16.mxu0 %vm399_vm1, %v2282_v12  ;;  %3214 = vmatprep.subr.bf16.mxu1 %v3310_v3  ;;  %v2404_v4 = vpop.permute.xlu1 %2403  ;;  %v2411_v25 = vsel %vm399_vm1, %v2405_v23, 0 }
 0x5d6   : > { %2203 = vmatprep.mubr.bf16.mxu0 %v3312_v6  ;;  %v2406_v19 = vsel %vm3943_vm6, %v2402_v11, %v2404_v4  ;;  %v2417_v24 = vsel %vm399_vm1, %v2404_v4, 0 }
 0x5d7   : > { %v2524_v14 = vpop.permute.xlu0 %2523 }
 0x5d9   : > { %v2526_v20 = vpop.permute.xlu1 %2525 }
 0x5da   : > { %3211 = vmatmul.mubr.msk.bf16.vlgmr.msra.gmra.mxu1 %vm395_vm3, %v3074_v8  ;;  %v2529_v30 = vsel %vm3946_vm9, %v2524_v14, %v2526_v20 }
 0x5db   : > { %3215 = vmatpush3.bf16.msra.mxu1 %v2293_v15  ;;  %3076 = vmatmul.mubr.msk.bf16.vlgmr.msra.gmra.mxu0 %vm395_vm3, %v3074_v8  ;;  %v2528_v21 = vpop.permute.xlu0 %2527  ;;  %v2535_v33 = vsel %vm399_vm1, %v2529_v30, 0 }
 0x5dc   : > { %2310 = vmatpush1.bf16.msra.mxu0 %v2287_v16  ;;  %3216 = vmatprep.mubr.msk.bf16.mxu1 %vm3937_vm10, %v3310_v3  ;;  %v2530_v27 = vsel %vm3945_vm11, %v2526_v20, %v2528_v21  ;;  %v2541_v32 = vsel %vm399_vm1, %v2528_v21, 0 }
 0x5dd   : > { %3083 = vmatprep.subr.msk.bf16.mxu0 %vm399_vm1, %v2406_v19  ;;  %3220 = vmatprep.subr.bf16.mxu1 %v3310_v3  ;;  %v2648_v26 = vpop.permute.xlu1 %2647 }
 0x5de   : > { %2327 = vmatprep.mubr.bf16.mxu0 %v3312_v6 }
 0x5df   : > { %v2650_v28 = vpop.permute.xlu0 %2649 }
 0x5e0   : > { %v2653_v37 = vsel %vm3948_vm15, %v2648_v26, %v2650_v28 }
 0x5e1   : > { %v2652_v31 = vpop.permute.xlu1 %2651  ;;  %v2659_v17 = vsel %vm399_vm1, %v2653_v37, 0 }
 0x5e2   : > { %3217 = vmatmul.mubr.msk.bf16.vlgmr.msra.gmra.mxu1 %vm395_vm3, %v3078_v22  ;;  %v2654_v36 = vsel %vm3947_vm2, %v2650_v28, %v2652_v31  ;;  %v2665_v39 = vsel %vm399_vm1, %v2652_v31, 0 }
 0x5e3   : > { %3221 = vmatpush3.bf16.msra.mxu1 %v2417_v24  ;;  %3080 = vmatmul.mubr.msk.bf16.vlgmr.msra.gmra.mxu0 %vm395_vm3, %v3078_v22  ;;  %v2772_v35 = vpop.permute.xlu0 %2771 }
 0x5e4   : > { %2434 = vmatpush1.bf16.msra.mxu0 %v2411_v25  ;;  %3222 = vmatprep.mubr.msk.bf16.mxu1 %vm3937_vm10, %v3310_v3 }
 0x5e5   : > { %3087 = vmatprep.subr.msk.bf16.mxu0 %vm399_vm1, %v2530_v27  ;;  %3226 = vmatprep.subr.bf16.mxu1 %v3310_v3  ;;  %v2774_v18 = vpop.permute.xlu1 %2773 }
 0x5e6   : > { %2451 = vmatprep.mubr.bf16.mxu0 %v3312_v6  ;;  %v2777_v45 = vsel %vm3950_vm4, %v2772_v35, %v2774_v18 }
 0x5e7   : > { %v2776_v40 = vpop.permute.xlu0 %2775  ;;  %v2783_v47 = vsel %vm399_vm1, %v2777_v45, 0 }
 0x5e8   : > { %v2778_v34 = vsel %vm3949_vm0, %v2774_v18, %v2776_v40  ;;  %v2789_v46 = vsel %vm399_vm1, %v2776_v40, 0 }
 0x5ea   : > { %3223 = vmatmul.mubr.msk.bf16.vlgmr.msra.gmra.mxu1 %vm395_vm3, %v3082_v29 }
 0x5eb   : > { %3227 = vmatpush3.bf16.msra.mxu1 %v2541_v32  ;;  %3084 = vmatmul.mubr.msk.bf16.vlgmr.msra.gmra.mxu0 %vm395_vm3, %v3082_v29 }
 0x5ec   : > { %2558 = vmatpush1.bf16.msra.mxu0 %v2535_v33  ;;  %3228 = vmatprep.mubr.msk.bf16.mxu1 %vm3937_vm10, %v3310_v3 }
 0x5ed   : > { %3091 = vmatprep.subr.msk.bf16.mxu0 %vm399_vm1, %v2654_v36  ;;  %3232 = vmatprep.subr.bf16.mxu1 %v3310_v3 }
 0x5ee   : > { %2575 = vmatprep.mubr.bf16.mxu0 %v3312_v6 }
 0x5f2   : > { %3229 = vmatmul.mubr.msk.bf16.vlgmr.msra.gmra.mxu1 %vm395_vm3, %v3086_v56 }
 0x5f3   : > { %3233 = vmatpush3.bf16.msra.mxu1 %v2665_v39  ;;  %3088 = vmatmul.mubr.msk.bf16.vlgmr.msra.gmra.mxu0 %vm395_vm3, %v3086_v56 }
 0x5f4   : > { %2682 = vmatpush1.bf16.msra.mxu0 %v2659_v17  ;;  %3234 = vmatprep.mubr.msk.bf16.mxu1 %vm3937_vm10, %v3310_v3 }
 0x5f5   : > { %3095 = vmatprep.subr.msk.bf16.mxu0 %vm399_vm1, %v2778_v34  ;;  %3238 = vmatprep.subr.bf16.mxu1 %v3310_v3  ;;  %vm3951_vm1 = vcmask 1043456  }
 0x5f6   : > { %2699 = vmatprep.mubr.bf16.mxu0 %v3312_v6  ;;  %vm3954_vm5 = vmmov %vm3951_vm1 }
 0x5f7   : > { %vm3955_vm8 = vmmov %vm3951_vm1 }
 0x5fa   : > { %3235 = vmatmul.mubr.msk.bf16.vlgmr.msra.gmra.mxu1 %vm395_vm3, %v3090_v42 }
 0x5fb   : > { %3239 = vmatpush3.bf16.msra.mxu1 %v2789_v46  ;;  %3092 = vmatmul.mubr.msk.bf16.vlgmr.msra.gmra.mxu0 %vm395_vm3, %v3090_v42 }
 0x5fc   : > { %2806 = vmatpush1.bf16.msra.mxu0 %v2783_v47  ;;  %3240 = vmatprep.mubr.msk.bf16.mxu1 %vm3937_vm10, %v3310_v3  ;;  %vm3953_vm10 = vcmask 240640  }
 0x5fd   : > { %2823 = vmatprep.mubr.bf16.mxu0 %v3312_v6  ;;  %vm3959_vm6 = vmmov %vm3953_vm10 }
 0x602   : > { %3241 = vmatmul.mubr.msk.bf16.vlgmr.msra.gmra.mxu1 %vm395_vm3, %v3094_v48 }
 0x603   : > { %3096 = vmatmul.mubr.msk.bf16.vlgmr.msra.gmra.mxu0 %vm395_vm3, %v3094_v48  ;;  %vm3952_vm3 = vmmov %vm3951_vm1 }
 0x682   : > { %v1908_v7 = vpop.f32.mrf.mxu1 }
 0x683   : > { %v1867_v49 = vpop.f32.mrf.mxu0 }
 0x684   : > { %v3194_v50 = vpop.f32.mrf.mxu1 }
 0x685   : > { %v1869_v60 = vpop.f32.mrf.mxu0 }
 0x686   : > { %v1911_v51 = vpop.f32.mrf.mxu1 }
 0x687   : > { %v1871_v52 = vpop.f32.mrf.mxu0 }
 0x688   : > { %v3195_v53 = vpop.f32.mrf.mxu1 }
 0x689   : > { %v1872_v41 = vpop.f32.mrf.mxu0 }
 0x68a   : > { %v2001_v54 = vpop.f32.mrf.mxu1 }
 0x68b   : > { %v1960_v3 = vpop.f32.mrf.mxu0  ;;  %v2002_v40 = vadd.f32 %v2001_v54, %v1908_v7 }
 0x68c   : > { %v3200_v55 = vpop.f32.mrf.mxu1  ;;  %v1961_v17 = vadd.f32 %v1960_v3, %v1867_v49 }
 0x68d   : > { %v1962_v6 = vpop.f32.mrf.mxu0 }
 0x68e   : > { %v2004_v57 = vpop.f32.mrf.mxu1  ;;  %v1963_v45 = vadd.f32 %v1962_v6, %v1869_v60 }
 0x68f   : > { %v1964_v59 = vpop.f32.mrf.mxu0 }
 0x690   : > { %v3201_v61 = vpop.f32.mrf.mxu1 }
 0x691   : > { %v1965_v62 = vpop.f32.mrf.mxu0 }
 0x692   : > { %v2122_v0 = vpop.f32.mrf.mxu1 }
 0x693   : > { %v2081_v1 = vpop.f32.mrf.mxu0  ;;  %v2130_v34 = vadd.f32 %v2122_v0, %v2002_v40 }
 0x694   : > { %v3206_v5 = vpop.f32.mrf.mxu1  ;;  %v2128_v46 = vadd.f32 %v2081_v1, %v1961_v17 }
 0x695   : > { %v2083_v63 = vpop.f32.mrf.mxu0 }
 0x696   : > { %v2125_v9 = vpop.f32.mrf.mxu1  ;;  %v2129_v51 = vadd.f32 %v2083_v63, %v1963_v45  ;;  %v2938_v45 = vld [vmem:[%s3407_s18] sm:$0x3f]  ;;  %s3245_s18 = smul.u32 12, %s3961_s14 }
 0x697   : > { %v2085_v10 = vpop.f32.mrf.mxu0 }
 0x698   : > { %v3207_v58 = vpop.f32.mrf.mxu1  ;;  %s359_s16 = scalar_lea.vmem %s3918_s10, %s3245_s18 }
 0x699   : > { %v2086_v2 = vpop.f32.mrf.mxu0 }
 0x69a   : > { %v2246_v11 = vpop.f32.mrf.mxu1 }
 0x69b   : > { %v2205_v12 = vpop.f32.mrf.mxu0  ;;  %v2254_v48 = vadd.f32 %v2246_v11, %v2130_v34 }
 0x69c   : > { %v3212_v4 = vpop.f32.mrf.mxu1  ;;  %v2252_v52 = vadd.f32 %v2205_v12, %v2128_v46  ;;  %v2939_v46 = vunpack.c.l.bf16 %v2938_v45 }
 0x69d   : > { %v2207_v8 = vpop.f32.mrf.mxu0  ;;  %v2879_v4 = vpop.permute.xlu1 %2878 }
 0x69e   : > { %v2249_v13 = vpop.f32.mrf.mxu1  ;;  %v2253_v57 = vadd.f32 %v2207_v8, %v2129_v51  ;;  %v2943_v44 = vcombine.high %v2939_v46, %v2939_v46 }
 0x69f   : > { %v2209_v14 = vpop.f32.mrf.mxu0 }
 0x6a0   : > { %v3213_v15 = vpop.f32.mrf.mxu1 }
 0x6a1   : > { %v2210_v16 = vpop.f32.mrf.mxu0 }
 0x6a2   : > { %v2370_v19 = vpop.f32.mrf.mxu1 }
 0x6a3   : > { %v2329_v20 = vpop.f32.mrf.mxu0  ;;  %v2378_v41 = vadd.f32 %v2370_v19, %v2254_v48  ;;  %v2940_v48 = vunpack.c.h.bf16 %v2938_v45 }
 0x6a4   : > { %v3218_v21 = vpop.f32.mrf.mxu1  ;;  %v2376_v59 = vadd.f32 %v2329_v20, %v2252_v52 }
 0x6a5   : > { %v2331_v22 = vpop.f32.mrf.mxu0 }
 0x6a6   : > { %v2373_v23 = vpop.f32.mrf.mxu1  ;;  %v2377_v54 = vadd.f32 %v2331_v22, %v2253_v57 }
 0x6a7   : > { %v2333_v24 = vpop.f32.mrf.mxu0 }
 0x6a8   : > { %v3219_v25 = vpop.f32.mrf.mxu1 }
 0x6a9   : > { %v2334_v26 = vpop.f32.mrf.mxu0 }
 0x6aa   : > { %v2494_v27 = vpop.f32.mrf.mxu1 }
 0x6ab   : > { %v2453_v28 = vpop.f32.mrf.mxu0  ;;  %v2502_v62 = vadd.f32 %v2494_v27, %v2378_v41 }
 0x6ac   : > { %v3224_v29 = vpop.f32.mrf.mxu1  ;;  %v2500_v49 = vadd.f32 %v2453_v28, %v2376_v59 }
 0x6ad   : > { %v2455_v30 = vpop.f32.mrf.mxu0 }
 0x6ae   : > { %v2497_v31 = vpop.f32.mrf.mxu1  ;;  %v2501_v60 = vadd.f32 %v2455_v30, %v2377_v54 }
 0x6af   : > { %v2457_v32 = vpop.f32.mrf.mxu0 }
 0x6b0   : > { %v3225_v33 = vpop.f32.mrf.mxu1 }
 0x6b1   : > { %v2458_v35 = vpop.f32.mrf.mxu0 }
 0x6b2   : > { %v2618_v36 = vpop.f32.mrf.mxu1 }
 0x6b3   : > { %v2577_v56 = vpop.f32.mrf.mxu0  ;;  %v2626_v0 = vadd.f32 %v2618_v36, %v2502_v62 }
 0x6b4   : > { %v3230_v37 = vpop.f32.mrf.mxu1  ;;  %v2624_v6 = vadd.f32 %v2577_v56, %v2500_v49 }
 0x6b5   : > { %v2579_v39 = vpop.f32.mrf.mxu0 }
 0x6b6   : > { %v2621_v18 = vpop.f32.mrf.mxu1  ;;  %v2625_v63 = vadd.f32 %v2579_v39, %v2501_v60 }
 0x6b7   : > { %v2581_v42 = vpop.f32.mrf.mxu0 }
 0x6b8   : > { %v3231_v47 = vpop.f32.mrf.mxu1 }
 0x6b9   : > { %v2582_v50 = vpop.f32.mrf.mxu0  ;;  %v2920_v47 = vld [vmem:[%s3916_s8] sm:$0xf] }
 0x6ba   : > { %v2742_v53 = vpop.f32.mrf.mxu1  ;;  %v3274_v50 = vpack.i.bf16 %v2943_v44, %v2939_v46 }
 0x6bb   : > { %v2701_v55 = vpop.f32.mrf.mxu0  ;;  %v2750_v9 = vadd.f32 %v2742_v53, %v2626_v0 }
 0x6bc   : > { %v3236_v61 = vpop.f32.mrf.mxu1  ;;  %v2748_v58 = vadd.f32 %v2701_v55, %v2624_v6 }
 0x6bd   : > { %v2703_v7 = vpop.f32.mrf.mxu0 }
 0x6be   : > { %v2745_v3 = vpop.f32.mrf.mxu1  ;;  %v2749_v8 = vadd.f32 %v2703_v7, %v2625_v63 }
 0x6bf   : > { %v2705_v5 = vpop.f32.mrf.mxu0 }
 0x6c0   : > { %v3237_v1 = vpop.f32.mrf.mxu1 }
 0x6c1   : > { %v2706_v10 = vpop.f32.mrf.mxu0 }
 0x6c2   : > { %v2866_v2 = vpop.f32.mrf.mxu1 }
 0x6c3   : > { %v2874_v11 = vadd.f32 %v2866_v2, %v2750_v9  ;;  %v2825_v12 = vpop.f32.mrf.mxu0 }
 0x6c4   : > { %v2872_v13 = vadd.f32 %v2825_v12, %v2748_v58  ;;  %v3242_v14 = vpop.f32.mrf.mxu1 }
 0x6c5   : > { %v2883_v15 = vadd.f32 %v2879_v4, %v2874_v11  ;;  %v2827_v16 = vpop.f32.mrf.mxu0 }
 0x6c6   : > { %v2881_v19 = vadd.f32 %v2879_v4, %v2872_v13  ;;  %v2873_v20 = vadd.f32 %v2827_v16, %v2749_v8  ;;  %v2869_v21 = vpop.f32.mrf.mxu1 }
 0x6c7   : > { %v2829_v22 = vpop.f32.mrf.mxu0  ;;  %v2896_v27 = vmul.f32 %v2883_v15, %v2883_v15  ;;  %v2886_v31 = vsel %vm3625_vm14, %v2883_v15, 0.0 }
 0x6c8   : > { %v2894_v23 = vmul.f32 %v2881_v19, %v2881_v19  ;;  %v2882_v24 = vadd.f32 %v2879_v4, %v2873_v20  ;;  %v3243_v25 = vpop.f32.mrf.mxu1  ;;  %v2884_v26 = vsel %vm3617_vm12, %v2881_v19, 0.0  ;;  %v2890_v40 = vsel %vm3953_vm10, %v2886_v31, 0.0 }
 0x6c9   : > { %v2830_v28 = vpop.f32.mrf.mxu0  ;;  %v2887_v33 = vsel %vm3951_vm1, %v2884_v26, 0.0  ;;  %v2899_v37 = vsel %vm3625_vm14, %v2896_v27, 0.0 }
 0x6ca   : > { %v2895_v29 = vmul.f32 %v2882_v24, %v2882_v24  ;;  %v2885_v30 = vsel %vm3621_vm13, %v2882_v24, 0.0  ;;  %v2897_v32 = vsel %vm3617_vm12, %v2894_v23, 0.0  ;;  %vm3956_vm12 = vmmov %vm3953_vm10 }
 0x6cb   : > { %v2888_v35 = vsel %vm3952_vm3, %v2885_v30, 0.0  ;;  %v2900_v39 = vsel %vm3954_vm5, %v2897_v32, 0.0  ;;  %v2903_v34 = vsel %vm3956_vm12, %v2899_v37, 0.0 }
 0x6cc   : > { %v2889_v36 = vadd.f32 %v2888_v35, %v2887_v33  ;;  %v2898_v56 = vsel %vm3621_vm13, %v2895_v29, 0.0  ;;  %vm3957_vm13 = vcmask 891904  }
 0x6cd   : > { %v2901_v17 = vsel %vm3955_vm8, %v2898_v56, 0.0  ;;  %vm3958_vm14 = vmmov %vm3957_vm13 }
 0x6ce   : > { %v2891_v38 = vadd.f32 %v2890_v40, %v2889_v36  ;;  %v2902_v18 = vadd.f32 %v2901_v17, %v2900_v39 }
 0x6d0   : > { %2892 = vadd.xlane.f32.xlu0 %v2891_v38  ;;  %v2904_v42 = vadd.f32 %v2903_v34, %v2902_v18 }
 0x6d2   : > { %2905 = vadd.xlane.f32.xlu1 %v2904_v42 }
 0x6e3   : > { %2932 = vperm.xlu1 %3273, %v2929_v43  }
 0x6e6   : > { %2923 = vperm.xlu0 %3272, %v2920_v47  }
 0x6e7   : > { %2948 = vrot.lane.b32.xlu1 %v2940_v48, %s3316_s22 }
 0x6ea   : > { %3275 = vrot.lane.b32.xlu0 %v3274_v50, %s3316_s22 }
 0x759   : > { %v2893_v51 = vpop.xlane.xlu0 %2892 }
 0x75a   : > { %v2907_v52 = vmul.f32 0.00390625, %v2893_v51 }
 0x75b   : > { %v2906_v53 = vpop.xlane.xlu1 %2905 }
 0x75c   : > { %v2908_v41 = vmul.f32 0.00390625, %v2906_v53  ;;  %v2909_v55 = vmul.f32 %v2907_v52, %v2907_v52  ;;  %v2912_v49 = vsub.f32 %v2881_v19, %v2907_v52  ;;  %v2913_v3 = vsub.f32 %v2882_v24, %v2907_v52 }
 0x75d   : > { %v2914_v0 = vsub.f32 %v2883_v15, %v2907_v52 }
 0x75e   : > { %v2910_v57 = vsub.f32 %v2908_v41, %v2909_v55 }
 0x75f   : > { %v2933_v7 = vpop.permute.xlu1 %2932 }
 0x760   : > { %v2911_v59 = vmax.f32 %v2910_v57, 0.0 }
 0x761   : > { %v2924_v62 = vpop.permute.xlu0 %2923 }
 0x762   : > { %v2915_v61 = vadd.f32 1e-05, %v2911_v59 }
 0x763   : > { %v2949_v63 = vpop.permute.xlu1 %2948 }
 0x764   : > { %3299 = vrsqrt.f32 %v2915_v61 }
 0x765   : > { %v3276_v54 = vpop.permute.xlu0 %3275 }
 0x766   : > { %v3278_v60 = vunpack.i.h.bf16 %v3276_v54  ;;  %v3277_v6 = vunpack.i.l.bf16 %v3276_v54 }
 0x768   : > { %v2951_v12 = vsel %vm3957_vm13, %v3277_v6, %v3278_v60  ;;  %v2952_v4 = vsel %vm3958_vm14, %v3278_v60, %v2949_v63 }
 0x771   : > { %v3300_v5 = vpop.eup %3299 }
 0x772   : > { %v2917_v1 = vmul.f32 %v3300_v5, %v2912_v49  ;;  %v2918_v9 = vmul.f32 %v3300_v5, %v2913_v3  ;;  %v2919_v10 = vmul.f32 %v3300_v5, %v2914_v0 }
 0x774   : > { %v2926_v58 = vmul.f32 %v2924_v62, %v2917_v1  ;;  %v2927_v2 = vmul.f32 %v2924_v62, %v2918_v9  ;;  %v2928_v11 = vmul.f32 %v2924_v62, %v2919_v10 }
 0x776   : > { %v2935_v8 = vadd.f32 %v2933_v7, %v2926_v58  ;;  %v2936_v13 = vadd.f32 %v2933_v7, %v2927_v2  ;;  %v2937_v14 = vadd.f32 %v2933_v7, %v2928_v11 }
 0x778   : > { %v2956_v15 = vadd.f32 %v2951_v12, %v2935_v8  ;;  %v2957_v16 = vadd.f32 %v2952_v4, %v2936_v13  ;;  %v2958_v19 = vadd.f32 %v2949_v63, %v2937_v14 }
 0x77a   : > { %v2961_v20 = vcombine.low %v2956_v15, %v2957_v16  ;;  %2964 = vst.msk [vmem:[%s359_s16 + $0x8] sm:$0xf] %vm3959_vm6, %v2958_v19 }
 0x77c   : > { %2963 = vst [vmem:[%s359_s16] sm:$0xff] %v2961_v20 }
 0x77d PF: > { %s20_s13 = sadd.s32 1, %s3307_s13  }
 0x77e   : > { %p17_p4 = scmp.ge.s32.totalorder %s20_s13, 4  }
 0x780   :  { %19 = sbr.rel (!%p17_p4) target bundleno = 1 (0x1), region = 106 }

</bundles_post_ra>
